<compile_context>
chip_gen: v7x
topology: tpu7x:2x2x1
jax: 0.10.0
libtpu: 0.0.40
codegen_flags: <defaults>
</compile_context>

<pallas_src>
import numpy as np
import jax
import jax.numpy as jnp
from jax.experimental import pallas as pl
from jax.experimental.pallas import tpu as pltpu


def _round_up(x, m):
    return (x + m - 1) // m * m


# ---------------------------------------------------------------------------
# Plain-JAX glue: F.affine_grid / F.grid_sample equivalents (align_corners=False)
# used only to build the rotated convolution weights (parameter prep).
# ---------------------------------------------------------------------------
def affine_grid_3d(theta, size):
    """theta: (N,3,4); size: (N,C,D,H,W) -> grid (N,D,H,W,3) with (x,y,z)."""
    N, _, D, H, W = size

    def coords(n):
        i = jnp.arange(n, dtype=jnp.float32)
        return (2.0 * i + 1.0) / n - 1.0          # align_corners=False

    zs, ys, xs = coords(D), coords(H), coords(W)
    zz, yy, xx = jnp.meshgrid(zs, ys, xs, indexing="ij")        # (D,H,W)
    base = jnp.stack([xx, yy, zz, jnp.ones_like(xx)], axis=-1)  # (D,H,W,4)
    return jnp.einsum("dhwk,njk->ndhwj", base, theta)           # (N,D,H,W,3)


def grid_sample_3d(inp, grid):
    """inp: (N,C,D,H,W); grid: (N,Do,Ho,Wo,3) (x,y,z).  Trilinear, zeros pad,
    align_corners=False — matches torch.nn.functional.grid_sample defaults."""
    N, C, D, H, W = inp.shape
    gx, gy, gz = grid[..., 0], grid[..., 1], grid[..., 2]
    ix = ((gx + 1.0) * W - 1.0) * 0.5
    iy = ((gy + 1.0) * H - 1.0) * 0.5
    iz = ((gz + 1.0) * D - 1.0) * 0.5
    ix0, iy0, iz0 = jnp.floor(ix), jnp.floor(iy), jnp.floor(iz)
    ix1, iy1, iz1 = ix0 + 1.0, iy0 + 1.0, iz0 + 1.0
    wx1, wy1, wz1 = ix - ix0, iy - iy0, iz - iz0
    wx0, wy0, wz0 = 1.0 - wx1, 1.0 - wy1, 1.0 - wz1

    def gather(zc, yc, xc):
        valid = ((xc >= 0) & (xc <= W - 1) & (yc >= 0) & (yc <= H - 1)
                 & (zc >= 0) & (zc <= D - 1))
        xi = jnp.clip(xc, 0, W - 1).astype(jnp.int32)
        yi = jnp.clip(yc, 0, H - 1).astype(jnp.int32)
        zi = jnp.clip(zc, 0, D - 1).astype(jnp.int32)
        vals = jax.vmap(lambda im, z_, y_, x_: im[:, z_, y_, x_])(inp, zi, yi, xi)
        return vals * valid[:, None].astype(inp.dtype)

    def w_(a, b, c):
        return (a * b * c)[:, None]

    return (gather(iz0, iy0, ix0) * w_(wz0, wy0, wx0)
            + gather(iz0, iy0, ix1) * w_(wz0, wy0, wx1)
            + gather(iz0, iy1, ix0) * w_(wz0, wy1, wx0)
            + gather(iz0, iy1, ix1) * w_(wz0, wy1, wx1)
            + gather(iz1, iy0, ix0) * w_(wz1, wy0, wx0)
            + gather(iz1, iy0, ix1) * w_(wz1, wy0, wx1)
            + gather(iz1, iy1, ix0) * w_(wz1, wy1, wx0)
            + gather(iz1, iy1, ix1) * w_(wz1, wy1, wx1))


# ---------------------------------------------------------------------------
# Pallas kernel: Gt rotation groups per step, im2col matmul (MXU) + fused bias.
# ---------------------------------------------------------------------------
def _make_group_matmul_kernel(gt):
    def kernel(w_ref, p_ref, b_ref, o_ref):
        """w_ref : VMEM (Gt, CO_p, K_p)   bf16 rotated weights (zero padded)
           p_ref : VMEM (Gt, K_p, Mblk)   bf16 im2col patches  (zero padded)
           b_ref : VMEM (CO_p, 1)         f32 bias (zero padded)
           o_ref : VMEM (Gt, CO_p, Mblk)  f32/x-dtype lane-dense output slab
        """
        def body(g, carry):
            acc = jnp.dot(w_ref[g], p_ref[g],
                          preferred_element_type=jnp.float32)   # default precision
            o_ref[g] = (acc + b_ref[...]).astype(o_ref.dtype)
            return carry
        jax.lax.fori_loop(0, gt, body, 0, unroll=True)
    return kernel


def grouped_conv3d_pallas(x_gm, weights, bias, kernel_size, out_dtype):
    """Grouped VALID 3-D cross-correlation + bias.

    x_gm    : (G, CI, Beff, X, Y, Z)   group-major input
    weights : (G, CO, CI, KX, KY, KZ)
    bias    : (CO,)
    returns : (G, CO, Beff, OX, OY, OZ)
    """
    G, CI, Beff, X, Y, Z = x_gm.shape
    KX, KY, KZ = kernel_size
    CO = weights.shape[1]
    OX, OY, OZ = X - KX + 1, Y - KY + 1, Z - KZ + 1
    K3 = KX * KY * KZ
    Kdim = CI * K3
    M = Beff * OX * OY * OZ

    compute_dtype = jnp.bfloat16   # halves the dominant DMA stream; f32 accumulate

    # ---- im2col: x is already group-major so the stack reshapes straight
    #      into (G, K, M) with NO large transpose --------------------------
    xt = x_gm.astype(compute_dtype)
    taps = []
    for dx in range(KX):
        for dy in range(KY):
            for dz in range(KZ):
                taps.append(xt[:, :, :, dx:dx + OX, dy:dy + OY, dz:dz + OZ])
    # (G, CI, K3, Beff, OX, OY, OZ) -> (G, CI*K3, Beff*OX*OY*OZ): contiguous reshape
    patches = jnp.stack(taps, axis=2).reshape(G, Kdim, M)

    w2 = weights.reshape(G, CO, Kdim).astype(compute_dtype)    # same K ordering

    # ---- pad to TPU-friendly shapes (zeros contribute nothing) ------------
    CO_p = _round_up(CO, 8)                 # f32 output sublane multiple
    K_p = _round_up(Kdim, 16)               # bf16 sublane packing multiple
    M_TILE = 4096                           # lane tile (multiple of 128)
    if M <= M_TILE:
        M_p = _round_up(M, 128)
        m_blk = M_p
    else:
        M_p = _round_up(M, M_TILE)
        m_blk = M_TILE
    m_tiles = M_p // m_blk

    patches = jnp.pad(patches, ((0, 0), (0, K_p - Kdim), (0, M_p - M)))
    w2 = jnp.pad(w2, ((0, 0), (0, CO_p - CO), (0, K_p - Kdim)))
    b2 = jnp.pad(bias.astype(jnp.float32), (0, CO_p - CO)).reshape(CO_p, 1)

    # ---- group blocking: few large steps; keep an even "parallel" step
    #      count so both v7x TensorCores get work ---------------------------
    if G % 4 == 0 and G >= 4:
        n_steps = 4
    elif G % 2 == 0:
        n_steps = 2
    else:
        n_steps = G
    Gt = G // n_steps

    kernel = _make_group_matmul_kernel(Gt)

    grid_spec = pltpu.PrefetchScalarGridSpec(
        num_scalar_prefetch=0,
        grid=(n_steps, m_tiles),
        in_specs=[
            pl.BlockSpec((Gt, CO_p, K_p), lambda s, m: (s, 0, 0)),    # weights
            pl.BlockSpec((Gt, K_p, m_blk), lambda s, m: (s, 0, m)),   # patches
            pl.BlockSpec((CO_p, 1), lambda s, m: (0, 0)),             # bias
        ],
        out_specs=pl.BlockSpec((Gt, CO_p, m_blk), lambda s, m: (s, 0, m)),
    )
    out = pl.pallas_call(
        kernel,
        out_shape=jax.ShapeDtypeStruct((G, CO_p, M_p), out_dtype),
        grid_spec=grid_spec,
        compiler_params=pltpu.CompilerParams(
            dimension_semantics=("parallel", "parallel"),
            vmem_limit_bytes=48 * 1024 * 1024),   # safe on v7x's 64 MiB VMEM
    )(w2, patches, b2)

    return out[:, :CO, :M].reshape(G, CO, Beff, OX, OY, OZ)


# ---------------------------------------------------------------------------
# Module equivalent
# ---------------------------------------------------------------------------
class SteerableSpatialConvPallas:
    def __init__(self, nfeature_in, nfeature_out, kernel_size,
                 rotation_matrices, key, use_bias=True):
        self.nfi = nfeature_in
        self.nfo = nfeature_out
        self.kernel_size = tuple(kernel_size)
        kD, kH, kW = self.kernel_size

        # torch.nn.init.xavier_normal_ on shape (nfo*nfi, kD, kH, kW)
        fan_in = kD * kH * kW
        fan_out = nfeature_out * nfeature_in * kH * kW
        std = (2.0 / (fan_in + fan_out)) ** 0.5
        self.kernel = std * jax.random.normal(
            key, (nfeature_out * nfeature_in, kD, kH, kW), dtype=jnp.float32)

        rot = jnp.concatenate(
            [rotation_matrices,
             jnp.zeros(rotation_matrices.shape[:-1] + (1,),
                       rotation_matrices.dtype)], axis=-1).astype(jnp.float32)
        m, n = rot.shape[-2:]
        rot = rot.reshape(-1, m, n)
        self.num_rot = rot.shape[0]
        self.inter_grid = affine_grid_3d(
            rot, (self.num_rot, nfeature_out * nfeature_in, kD, kH, kW))
        self.bias = (0.01 * jnp.ones((nfeature_out,), jnp.float32)
                     if use_bias else jnp.zeros((nfeature_out,), jnp.float32))

    def rotated_weights(self):
        # TODO(synk): grid_sample rotation prep stays in plain JAX (tiny,
        # gather-heavy parameter preparation; not a good Pallas fit).
        kD, kH, kW = self.kernel_size
        kn = jnp.tile(self.kernel[None], (self.num_rot, 1, 1, 1, 1))
        rk = grid_sample_3d(kn, self.inter_grid)
        return rk.reshape(self.num_rot, self.nfo, self.nfi, kD, kH, kW)

    def __call__(self, data):
        B, n_ver, kdim, f_in, X, Y, Z = data.shape
        rk = self.rotated_weights()                      # (R, CO, CI, kD, kH, kW)
        R = self.num_rot

        # Build group-major input directly with a single small transpose.
        if R == n_ver * kdim:                            # "num_rot == 60" branch
            xg = jnp.transpose(data, (1, 2, 3, 0, 4, 5, 6)).reshape(
                R, f_in, B, X, Y, Z)
        elif R == n_ver:                                 # "num_rot == 12" branch
            xg = jnp.transpose(data, (1, 3, 0, 2, 4, 5, 6)).reshape(
                R, f_in, B * kdim, X, Y, Z)
        else:
            raise ValueError("num_rot must equal n_ver or n_ver*kernel_dim")

        out = grouped_conv3d_pallas(xg, rk, self.bias, self.kernel_size,
                                    data.dtype)          # (R, CO, Beff, OX, OY, OZ)
        OX, OY, OZ = out.shape[-3:]
        if R == n_ver * kdim:
            out = out.reshape(n_ver, kdim, self.nfo, B, OX, OY, OZ)
            out = jnp.transpose(out, (3, 0, 1, 2, 4, 5, 6))
        else:
            out = out.reshape(n_ver, self.nfo, B, kdim, OX, OY, OZ)
            out = jnp.transpose(out, (2, 0, 3, 1, 4, 5, 6))
        return out                                        # (B, n_ver, kdim, CO, ...)


# ---------------------------------------------------------------------------
# Pure-JAX reference (XLA conv, f32) to validate the Pallas conv path.
# ---------------------------------------------------------------------------
def reference_forward(module, data):
    B, n_ver, kdim, f_in, X, Y, Z = data.shape
    rk = module.rotated_weights().reshape(-1, module.nfi, *module.kernel_size)
    R = module.num_rot
    if R == n_ver * kdim:
        lhs = data.reshape(B, n_ver * kdim * f_in, X, Y, Z)
    else:
        lhs = jnp.transpose(data, (0, 2, 1, 3, 4, 5, 6)).reshape(
            B * kdim, n_ver * f_in, X, Y, Z)
    out = jax.lax.conv_general_dilated(
        lhs, rk, window_strides=(1, 1, 1), padding="VALID",
        dimension_numbers=("NCDHW", "OIDHW", "NCDHW"),
        feature_group_count=R, precision=jax.lax.Precision.HIGHEST)
    out = out + jnp.tile(module.bias, R)[None, :, None, None, None]
    _, _, ox, oy, oz = out.shape
    if R == n_ver * kdim:
        out = out.reshape(B, n_ver, kdim, module.nfo, ox, oy, oz)
    else:
        out = out.reshape(B, kdim, n_ver, module.nfo, ox, oy, oz)
        out = jnp.swapaxes(out, 1, 2)
    return out


if __name__ == "__main__":
    key = jax.random.PRNGKey(0)
    k_kernel, k_data = jax.random.split(key)

    nfeature_in, nfeature_out = 2, 4
    kernel_size = (3, 3, 3)
    batch, n_ver, kernel_dim, grid_sz = 2, 12, 5, 8

    # 12 deterministic rotation matrices (rotations about z) -> num_rot == 12 branch
    angles = 2.0 * np.pi * np.arange(n_ver) / n_ver
    c, s = np.cos(angles).astype(np.float32), np.sin(angles).astype(np.float32)
    rot_np = np.zeros((n_ver, 3, 3), np.float32)
    rot_np[:, 0, 0] = c
    rot_np[:, 0, 1] = -s
    rot_np[:, 1, 0] = s
    rot_np[:, 1, 1] = c
    rot_np[:, 2, 2] = 1.0
    rotation_matrices = jnp.asarray(rot_np)

    module = SteerableSpatialConvPallas(
        nfeature_in, nfeature_out, kernel_size, rotation_matrices, k_kernel)

    data = jax.random.normal(
        k_data,
        (batch, n_ver, kernel_dim, nfeature_in, grid_sz, grid_sz, grid_sz),
        dtype=jnp.float32)

    fwd = jax.jit(module.__call__)
    out = jax.block_until_ready(fwd(data))
    ref = jax.block_until_ready(reference_forward(module, data))

    assert out.shape == (batch, n_ver, kernel_dim, nfeature_out,
                         grid_sz - 2, grid_sz - 2, grid_sz - 2), out.shape
    # bf16 MXU inputs (f32 accumulation) vs f32 HIGHEST reference: expect
    # ~1e-3..1e-2 relative error on 54-term dots, hence the looser tolerance.
    err = float(jnp.max(jnp.abs(out - ref)))
    assert jnp.allclose(out, ref, atol=3e-2, rtol=3e-2), err
    print("KERNEL_OK")
</pallas_src>

<mosaic_0001>
module attributes {stable_mosaic.version = 11 : i64} {
  func.func @kernel(%arg0: i32, %arg1: i32, %arg2: memref<3x8x64xbf16, #tpu.memory_space<vmem>>, %arg3: memref<3x64x2176xbf16, #tpu.memory_space<vmem>>, %arg4: memref<8x1xf32, #tpu.memory_space<vmem>>, %arg5: memref<3x8x2176xf32, #tpu.memory_space<vmem>>) attributes {dimension_semantics = [#tpu.dimension_semantics<parallel>, #tpu.dimension_semantics<parallel>], iteration_bounds = array<i64: 4, 1>, scalar_prefetch = 0 : i64, scratch_operands = 0 : i64, tpu.core_type = #tpu.core_type<tc>, window_params = [{transform_indices = @transform_0, window_bounds = array<i64: 3, 8, 64>}, {transform_indices = @transform_1, window_bounds = array<i64: 3, 64, 2176>}, {pipeline_mode = #tpu.pipeline_mode<synchronous>, transform_indices = @transform_2, window_bounds = array<i64: 8, 1>}, {transform_indices = @transform_3, window_bounds = array<i64: 3, 8, 2176>}]} {
    %c0_i32 = arith.constant 0 : i32
    %0 = arith.index_cast %c0_i32 : i32 to index
    %c0 = arith.constant 0 : index
    %c0_0 = arith.constant 0 : index
    %1 = vector.load %arg2[%0, %c0, %c0_0] : memref<3x8x64xbf16, #tpu.memory_space<vmem>>, vector<1x8x64xbf16>
    %2 = vector.shape_cast %1 : vector<1x8x64xbf16> to vector<8x64xbf16>
    %3 = arith.index_cast %c0_i32 : i32 to index
    %c0_1 = arith.constant 0 : index
    %c0_2 = arith.constant 0 : index
    %4 = vector.load %arg3[%3, %c0_1, %c0_2] : memref<3x64x2176xbf16, #tpu.memory_space<vmem>>, vector<1x64x2176xbf16>
    %5 = vector.shape_cast %4 : vector<1x64x2176xbf16> to vector<64x2176xbf16>
    %cst = arith.constant dense<0.000000e+00> : vector<8x2176xf32>
    %6 = tpu.matmul %2, %5, %cst {dimension_numbers = #tpu.dot_dimension_numbers<[1], [0], [0], [1], [0, 0, 1, 1], [], []>} : vector<8x64xbf16>, vector<64x2176xbf16>, vector<8x2176xf32> -> vector<8x2176xf32>
    %c0_3 = arith.constant 0 : index
    %c0_4 = arith.constant 0 : index
    %7 = vector.load %arg4[%c0_3, %c0_4] : memref<8x1xf32, #tpu.memory_space<vmem>>, vector<8x1xf32>
    %8 = vector.broadcast %7 : vector<8x1xf32> to vector<8x2176xf32>
    %9 = arith.addf %6, %8 : vector<8x2176xf32>
    %10 = arith.index_cast %c0_i32 : i32 to index
    %c0_5 = arith.constant 0 : index
    %c0_6 = arith.constant 0 : index
    %11 = vector.load %arg5[%10, %c0_5, %c0_6] : memref<3x8x2176xf32, #tpu.memory_space<vmem>>, vector<1x8x2176xf32>
    %12 = vector.shape_cast %11 : vector<1x8x2176xf32> to vector<8x2176xf32>
    %13 = vector.shape_cast %9 : vector<8x2176xf32> to vector<1x8x2176xf32>
    tpu.vector_store %arg5[%10, %c0_5, %c0_6], %13 {strides = array<i32>} : memref<3x8x2176xf32, #tpu.memory_space<vmem>>, vector<1x8x2176xf32>,
    %c1_i32 = arith.constant 1 : i32
    %14 = arith.index_cast %c1_i32 : i32 to index
    %c0_7 = arith.constant 0 : index
    %c0_8 = arith.constant 0 : index
    %15 = vector.load %arg2[%14, %c0_7, %c0_8] : memref<3x8x64xbf16, #tpu.memory_space<vmem>>, vector<1x8x64xbf16>
    %16 = vector.shape_cast %15 : vector<1x8x64xbf16> to vector<8x64xbf16>
    %17 = arith.index_cast %c1_i32 : i32 to index
    %c0_9 = arith.constant 0 : index
    %c0_10 = arith.constant 0 : index
    %18 = vector.load %arg3[%17, %c0_9, %c0_10] : memref<3x64x2176xbf16, #tpu.memory_space<vmem>>, vector<1x64x2176xbf16>
    %19 = vector.shape_cast %18 : vector<1x64x2176xbf16> to vector<64x2176xbf16>
    %cst_11 = arith.constant dense<0.000000e+00> : vector<8x2176xf32>
    %20 = tpu.matmul %16, %19, %cst_11 {dimension_numbers = #tpu.dot_dimension_numbers<[1], [0], [0], [1], [0, 0, 1, 1], [], []>} : vector<8x64xbf16>, vector<64x2176xbf16>, vector<8x2176xf32> -> vector<8x2176xf32>
    %c0_12 = arith.constant 0 : index
    %c0_13 = arith.constant 0 : index
    %21 = vector.load %arg4[%c0_12, %c0_13] : memref<8x1xf32, #tpu.memory_space<vmem>>, vector<8x1xf32>
    %22 = vector.broadcast %21 : vector<8x1xf32> to vector<8x2176xf32>
    %23 = arith.addf %20, %22 : vector<8x2176xf32>
    %24 = arith.index_cast %c1_i32 : i32 to index
    %c0_14 = arith.constant 0 : index
    %c0_15 = arith.constant 0 : index
    %25 = vector.load %arg5[%24, %c0_14, %c0_15] : memref<3x8x2176xf32, #tpu.memory_space<vmem>>, vector<1x8x2176xf32>
    %26 = vector.shape_cast %25 : vector<1x8x2176xf32> to vector<8x2176xf32>
    %27 = vector.shape_cast %23 : vector<8x2176xf32> to vector<1x8x2176xf32>
    tpu.vector_store %arg5[%24, %c0_14, %c0_15], %27 {strides = array<i32>} : memref<3x8x2176xf32, #tpu.memory_space<vmem>>, vector<1x8x2176xf32>,
    %c2_i32 = arith.constant 2 : i32
    %28 = arith.index_cast %c2_i32 : i32 to index
    %c0_16 = arith.constant 0 : index
    %c0_17 = arith.constant 0 : index
    %29 = vector.load %arg2[%28, %c0_16, %c0_17] : memref<3x8x64xbf16, #tpu.memory_space<vmem>>, vector<1x8x64xbf16>
    %30 = vector.shape_cast %29 : vector<1x8x64xbf16> to vector<8x64xbf16>
    %31 = arith.index_cast %c2_i32 : i32 to index
    %c0_18 = arith.constant 0 : index
    %c0_19 = arith.constant 0 : index
    %32 = vector.load %arg3[%31, %c0_18, %c0_19] : memref<3x64x2176xbf16, #tpu.memory_space<vmem>>, vector<1x64x2176xbf16>
    %33 = vector.shape_cast %32 : vector<1x64x2176xbf16> to vector<64x2176xbf16>
    %cst_20 = arith.constant dense<0.000000e+00> : vector<8x2176xf32>
    %34 = tpu.matmul %30, %33, %cst_20 {dimension_numbers = #tpu.dot_dimension_numbers<[1], [0], [0], [1], [0, 0, 1, 1], [], []>} : vector<8x64xbf16>, vector<64x2176xbf16>, vector<8x2176xf32> -> vector<8x2176xf32>
    %c0_21 = arith.constant 0 : index
    %c0_22 = arith.constant 0 : index
    %35 = vector.load %arg4[%c0_21, %c0_22] : memref<8x1xf32, #tpu.memory_space<vmem>>, vector<8x1xf32>
    %36 = vector.broadcast %35 : vector<8x1xf32> to vector<8x2176xf32>
    %37 = arith.addf %34, %36 : vector<8x2176xf32>
    %38 = arith.index_cast %c2_i32 : i32 to index
    %c0_23 = arith.constant 0 : index
    %c0_24 = arith.constant 0 : index
    %39 = vector.load %arg5[%38, %c0_23, %c0_24] : memref<3x8x2176xf32, #tpu.memory_space<vmem>>, vector<1x8x2176xf32>
    %40 = vector.shape_cast %39 : vector<1x8x2176xf32> to vector<8x2176xf32>
    %41 = vector.shape_cast %37 : vector<8x2176xf32> to vector<1x8x2176xf32>
    tpu.vector_store %arg5[%38, %c0_23, %c0_24], %41 {strides = array<i32>} : memref<3x8x2176xf32, #tpu.memory_space<vmem>>, vector<1x8x2176xf32>,
    %c3_i32 = arith.constant 3 : i32
    return
  }
  func.func @transform_0(%arg0: i32, %arg1: i32) -> (i32, i32, i32) {
    %c0_i32 = arith.constant 0 : i32
    %c0_i32_0 = arith.constant 0 : i32
    %c0_i32_1 = arith.constant 0 : i32
    return %arg0, %c0_i32, %c0_i32_0 : i32, i32, i32
  }
  func.func @transform_1(%arg0: i32, %arg1: i32) -> (i32, i32, i32) {
    %c0_i32 = arith.constant 0 : i32
    %c0_i32_0 = arith.constant 0 : i32
    return %arg0, %c0_i32, %arg1 : i32, i32, i32
  }
  func.func @transform_2(%arg0: i32, %arg1: i32) -> (i32, i32) {
    %c0_i32 = arith.constant 0 : i32
    %c0_i32_0 = arith.constant 0 : i32
    %c0_i32_1 = arith.constant 0 : i32
    return %c0_i32, %c0_i32_0 : i32, i32
  }
  func.func @transform_3(%arg0: i32, %arg1: i32) -> (i32, i32, i32) {
    %c0_i32 = arith.constant 0 : i32
    %c0_i32_0 = arith.constant 0 : i32
    return %arg0, %c0_i32, %arg1 : i32, i32, i32
  }
}

</mosaic_0001>

<bundles_post_ra>
// kernel: a_call__.1
= control target key start
LH: loop header
LB: loop body
LE: loop exit
PB: predicated region body
PF: predicated region fallthrough
CT: control target
= control target key end

     0   :  { %s3633_s12 = smov 0   ;;  %s3635_s13 = smov 0   ;;  %s4102_s0 = inlined_call_operand.vmem [shape: bf16[12,8,64], index: 0, kind: input, shape index: {}]   ;;  %s4103_s1 = inlined_call_operand.vmem [shape: bf16[12,64,2176], index: 1, kind: input, shape index: {}]   ;;  %s4104_s2 = inlined_call_operand.vmem [shape: f32[8,1], index: 2, kind: input, shape index: {}]   ;;  %s4105_s3 = inlined_call_operand.vmem [shape: f32[12,8,2176], index: 3, kind: output, shape index: {}]  }
   0x1   :  { %s3637_s14 = smov 0  }
   0x2 LB: > { %s25_s15 = sadd.s32 1, %s3604_s13  ;;  %p2787_p0 = scmp.ge.s32.totalorder %s3608_s14, 1  ;;  %s3608_s14 = sphi %s3637_s14, %s13_s14   ;;  %s3604_s13 = sphi %s3635_s13, %s4107_s13   ;;  %s3600_s12 = sphi %s3633_s12, %s4106_s12  }
   0x3   : > { %p27_p1 = scmp.ge.s32.totalorder %s25_s15, 4  ;;  %p171_p2 = scmp.lt.s32.totalorder %s3608_s14, 5 }
   0x5   : > { %s4109_s15 = smov (%p27_p1, %s25_s15), 0  ;;  %p172_p3 = pnand %p2787_p0, %p171_p2 }
   0x6   : > { %s210_s16 = smul.u32 (!%p172_p3), 3, %s3600_s12  ;;  %v314_v0 = vld [vmem:[%s4104_s2] sm:$0xff] (!%p172_p3)  ;;  %v3610_v1 = vmov (!%p172_p3), 0   ;;  %vm664_vm0 = vcmask (!%p172_p3), 523264   ;;  %vm3612_vm1 = vmmov (!%p172_p3), 0  }
   0x7   : > { %175 = sbr.rel (%p172_p3) target bundleno = 458 (0x1ca), region = 32  ;;  %700 = vmatprep.mubr.bf16.mxu0 (!%p172_p3), %v3610_v1  ;;  %741 = vmatprep.mubr.bf16.mxu1 (!%p172_p3), %v3610_v1 }
   0x8   : > { %p211_p4 = scmp.lt.s32.totalorder (!%p172_p3), %s210_s16, 11  ;;  %3284 = vset.pattern.permute.xlu0 (!%p172_p3), %v3610_v1  ;;  %3285 = vset.pattern.permute.xlu1 (!%p172_p3), %v3610_v1 }
   0x9   : > { %317 = vperm.xlu0 (!%p172_p3), %3284, %v314_v0   ;;  %1945 = vperm.xlu1 (!%p172_p3), %3285, %v314_v0  }
   0xd   : > { %1131 = vperm.xlu0 (!%p172_p3), %3284, %v314_v0  }
   0xe   : > { %s4111_s16 = smov (!%p211_p4, %s210_s16), 11 }
   0xf   : > { %s3255_s19 = smul.u32 544, %s4111_s16  ;;  %s2788_s23 = sshll.u32 %s4111_s16, 2 }
  0x10   : > { %s3683_s26 = scalar_lea.vmem %s4102_s0, %s2788_s23  ;;  %s3256_s27 = smul.u32 136, %s4111_s16 }
  0x11   : > { %s3664_s22 = scalar_lea.vmem %s4103_s1, %s3255_s19  ;;  %v3689_v18 = vld [vmem:[%s3683_s26] sm:$0xf] }
  0x12   : > { %v3286_v2 = vld [vmem:[%s3664_s22 + $0x4] ss:$68 sps:$4 sm:$0xff]   ;;  %v3289_v4 = vld [vmem:[%s3664_s22 + $0x8c] ss:$68 sps:$4 sm:$0xff]   ;;  %v3292_v6 = vld [vmem:[%s3664_s22 + $0x114] ss:$68 sps:$4 sm:$0xff]   ;;  %s3985_s30 = scalar_lea.vmem %s4105_s3, %s3256_s27 }
  0x13   : > { %v3288_v3 = vld [vmem:[%s3664_s22] ss:$68 sps:$4 sm:$0xff]   ;;  %668 = vmatprep.subr.bf16.mxu0 %v3286_v2  ;;  %v3291_v5 = vld [vmem:[%s3664_s22 + $0x88] ss:$68 sps:$4 sm:$0xff]   ;;  %v3294_v8 = vld [vmem:[%s3664_s22 + $0x110] ss:$68 sps:$4 sm:$0xff]  }
  0x14   : > { %669 = vmatpush1.bf16.msra.mxu0 %v3288_v3  ;;  %v3297_v7 = vld [vmem:[%s3664_s22 + $0xc] ss:$68 sps:$4 sm:$0xff]   ;;  %v3301_v10 = vld [vmem:[%s3664_s22 + $0x94] ss:$68 sps:$4 sm:$0xff]   ;;  %v3295_v11 = vld [vmem:[%s3664_s22 + $0x19c] ss:$68 sps:$4 sm:$0xff]  }
  0x15   : > { %670 = vmatprep.subr.bf16.mxu0 %v3289_v4  ;;  %v3300_v9 = vld [vmem:[%s3664_s22 + $0x8] ss:$68 sps:$4 sm:$0xff]   ;;  %709 = vmatprep.subr.bf16.mxu1 %v3297_v7  ;;  %v3306_v12 = vld [vmem:[%s3664_s22 + $0x90] ss:$68 sps:$4 sm:$0xff]   ;;  %v3307_v13 = vld [vmem:[%s3664_s22 + $0x11c] ss:$68 sps:$4 sm:$0xff]  }
  0x16   : > { %710 = vmatpush1.bf16.msra.mxu1 %v3300_v9  ;;  %v3299_v14 = vld [vmem:[%s3664_s22 + $0x198] ss:$68 sps:$4 sm:$0xff]   ;;  %v3313_v17 = vld [vmem:[%s3664_s22 + $0x1a4] ss:$68 sps:$4 sm:$0xff]   ;;  %v3303_v19 = vld [vmem:[%s3664_s22 + $0x10] ss:$68 sps:$4 sm:$0xff]  }
  0x17   : > { %711 = vmatprep.subr.bf16.mxu1 %v3301_v10  ;;  %v3305_v15 = vld [vmem:[%s3664_s22 + $0x14] ss:$68 sps:$4 sm:$0xff]   ;;  %v3311_v20 = vld [vmem:[%s3664_s22 + $0x9c] ss:$68 sps:$4 sm:$0xff]   ;;  %v3317_v24 = vld [vmem:[%s3664_s22 + $0x124] ss:$68 sps:$4 sm:$0xff]  }
  0x18   : > { %671 = vmatpush1.bf16.msra.mxu0 %v3291_v5  ;;  %v3312_v16 = vld [vmem:[%s3664_s22 + $0x118] ss:$68 sps:$4 sm:$0xff]   ;;  %v3318_v21 = vld [vmem:[%s3664_s22 + $0x1a0] ss:$68 sps:$4 sm:$0xff]   ;;  %v3321_v28 = vld [vmem:[%s3664_s22 + $0x1ac] ss:$68 sps:$4 sm:$0xff]  }
  0x19   : > { %672 = vmatprep.subr.bf16.mxu0 %v3292_v6  ;;  %v3324_v22 = vld [vmem:[%s3664_s22 + $0x1c] ss:$68 sps:$4 sm:$0xff]   ;;  %v3327_v26 = vld [vmem:[%s3664_s22 + $0xa4] ss:$68 sps:$4 sm:$0xff]   ;;  %v3333_v30 = vld [vmem:[%s3664_s22 + $0x12c] ss:$68 sps:$4 sm:$0xff]  }
  0x1a   : > { %712 = vmatpush1.bf16.msra.mxu1 %v3306_v12  ;;  %v3309_v23 = vld [vmem:[%s3664_s22 + $0x98] ss:$68 sps:$4 sm:$0xff]   ;;  %v3315_v27 = vld [vmem:[%s3664_s22 + $0x120] ss:$68 sps:$4 sm:$0xff]   ;;  %v3319_v31 = vld [vmem:[%s3664_s22 + $0x1a8] ss:$68 sps:$4 sm:$0xff]  }
  0x1b   : > { %713 = vmatprep.subr.bf16.mxu1 %v3307_v13  ;;  %v3322_v25 = vld [vmem:[%s3664_s22 + $0x18] ss:$68 sps:$4 sm:$0xff]   ;;  %v3325_v29 = vld [vmem:[%s3664_s22 + $0xa0] ss:$68 sps:$4 sm:$0xff]   ;;  %v3331_v33 = vld [vmem:[%s3664_s22 + $0x128] ss:$68 sps:$4 sm:$0xff]  }
  0x1c   : > { %673 = vmatpush1.bf16.msra.mxu0 %v3294_v8  ;;  %v3330_v32 = vld [vmem:[%s3664_s22 + $0x24] ss:$68 sps:$4 sm:$0xff]   ;;  %v3339_v34 = vld [vmem:[%s3664_s22 + $0x1b4] ss:$68 sps:$4 sm:$0xff]   ;;  %v3336_v36 = vld [vmem:[%s3664_s22 + $0xac] ss:$68 sps:$4 sm:$0xff]  }
  0x1d   : > { %674 = vmatprep.subr.bf16.mxu0 %v3295_v11  ;;  %v3328_v35 = vld [vmem:[%s3664_s22 + $0x20] ss:$68 sps:$4 sm:$0xff]   ;;  %v3337_v37 = vld [vmem:[%s3664_s22 + $0x1b0] ss:$68 sps:$4 sm:$0xff]   ;;  %v3334_v39 = vld [vmem:[%s3664_s22 + $0xa8] ss:$68 sps:$4 sm:$0xff]  }
  0x1e   : > { %714 = vmatpush1.bf16.msra.mxu1 %v3312_v16  ;;  %v3348_v38 = vld [vmem:[%s3664_s22 + $0x2c] ss:$68 sps:$4 sm:$0xff]   ;;  %v3342_v40 = vld [vmem:[%s3664_s22 + $0x134] ss:$68 sps:$4 sm:$0xff]   ;;  %v3345_v44 = vld [vmem:[%s3664_s22 + $0x1bc] ss:$68 sps:$4 sm:$0xff]  }
  0x1f   : > { %715 = vmatprep.subr.bf16.mxu1 %v3313_v17  ;;  %v3346_v41 = vld [vmem:[%s3664_s22 + $0x28] ss:$68 sps:$4 sm:$0xff]   ;;  %v3351_v42 = vld [vmem:[%s3664_s22 + $0xb4] ss:$68 sps:$4 sm:$0xff]   ;;  %v3357_v46 = vld [vmem:[%s3664_s22 + $0x13c] ss:$68 sps:$4 sm:$0xff]  }
  0x20   : > { %675 = vmatpush1.bf16.msra.mxu0 %v3299_v14  ;;  %v3340_v43 = vld [vmem:[%s3664_s22 + $0x130] ss:$68 sps:$4 sm:$0xff]   ;;  %v3343_v47 = vld [vmem:[%s3664_s22 + $0x1b8] ss:$68 sps:$4 sm:$0xff]   ;;  %v3363_v50 = vld [vmem:[%s3664_s22 + $0x1c4] ss:$68 sps:$4 sm:$0xff]  }
  0x21   : > { %750 = vmatprep.subr.bf16.mxu0 %v3305_v15  ;;  %v3349_v45 = vld [vmem:[%s3664_s22 + $0xb0] ss:$68 sps:$4 sm:$0xff]   ;;  %v3355_v49 = vld [vmem:[%s3664_s22 + $0x138] ss:$68 sps:$4 sm:$0xff]   ;;  %v3361_v53 = vld [vmem:[%s3664_s22 + $0x1c0] ss:$68 sps:$4 sm:$0xff]  }
  0x22   : > { %716 = vmatpush1.bf16.msra.mxu1 %v3318_v21  ;;  %v3354_v48 = vld [vmem:[%s3664_s22 + $0x34] ss:$68 sps:$4 sm:$0xff]   ;;  %v3360_v52 = vld [vmem:[%s3664_s22 + $0xbc] ss:$68 sps:$4 sm:$0xff]   ;;  %v3366_v56 = vld [vmem:[%s3664_s22 + $0x144] ss:$68 sps:$4 sm:$0xff]  }
  0x23   : > { %2859 = vmatmul.mubr.msk.bf16.vlgmr.msra.gmra.mrb[0].mxu0 %vm664_vm0, %v3689_v18  ;;  %791 = vmatprep.subr.bf16.mxu1 %v3324_v22  ;;  %v3352_v51 = vld [vmem:[%s3664_s22 + $0x30] ss:$68 sps:$4 sm:$0xff]   ;;  %v3372_v54 = vld [vmem:[%s3664_s22 + $0x3c] ss:$68 sps:$4 sm:$0xff]   ;;  %v3375_v58 = vld [vmem:[%s3664_s22 + $0xc4] ss:$68 sps:$4 sm:$0xff]  }
  0x24   : > { %751 = vmatpush1.bf16.msra.mxu0 %v3303_v19  ;;  %782 = vmatprep.mubr.bf16.mxu0 %v3610_v1  ;;  %v3358_v55 = vld [vmem:[%s3664_s22 + $0xb8] ss:$68 sps:$4 sm:$0xff]   ;;  %v3364_v59 = vld [vmem:[%s3664_s22 + $0x140] ss:$68 sps:$4 sm:$0xff]   ;;  %v3369_v60 = vld [vmem:[%s3664_s22 + $0x1cc] ss:$68 sps:$4 sm:$0xff]  }
  0x25   : > { %752 = vmatprep.subr.bf16.mxu0 %v3311_v20  ;;  %2860 = vmatmul.mubr.msk.bf16.vlgmr.msra.gmra.mrb[0].mxu1 %vm664_vm0, %v3689_v18  ;;  %v3370_v57 = vld [vmem:[%s3664_s22 + $0x38] ss:$68 sps:$4 sm:$0xff]   ;;  %v3373_v61 = vld [vmem:[%s3664_s22 + $0xc0] ss:$68 sps:$4 sm:$0xff]   ;;  %v3379_v62 = vld [vmem:[%s3664_s22 + $0x14c] ss:$68 sps:$4 sm:$0xff]  }
  0x26   : > { %792 = vmatpush1.bf16.msra.mxu1 %v3322_v25  ;;  %823 = vmatprep.mubr.bf16.mxu1 %v3610_v1  ;;  %v3367_v63 = vld [vmem:[%s3664_s22 + $0x1c8] ss:$68 sps:$4 sm:$0xff]   ;;  %v3383_v2 = vld [vmem:[%s3664_s22 + $0x1d4] ss:$68 sps:$4 sm:$0xff]   ;;  %v3376_v3 = vld [vmem:[%s3664_s22 + $0x40] ss:$68 sps:$4 sm:$0xff]  }
  0x27   : > { %793 = vmatprep.subr.bf16.mxu1 %v3327_v26  ;;  %v3377_v0 = vld [vmem:[%s3664_s22 + $0x148] ss:$68 sps:$4 sm:$0xff]   ;;  %v3611_v4 = vmov 0.0   ;;  %v3381_v5 = vld [vmem:[%s3664_s22 + $0x1d0] ss:$68 sps:$4 sm:$0xff]  }
  0x28   : > { %753 = vmatpush1.bf16.msra.mxu0 %v3309_v23  ;;  %v3387_v6 = vld [vmem:[%s3664_s22 + $0x224] ss:$68 sps:$4 sm:$0xff]   ;;  %v3391_v9 = vld [vmem:[%s3664_s22 + $0x2ac] ss:$68 sps:$4 sm:$0xff]   ;;  %v3397_v12 = vld [vmem:[%s3664_s22 + $0x334] ss:$68 sps:$4 sm:$0xff]  }
  0x29   : > { %754 = vmatprep.subr.bf16.mxu0 %v3317_v24  ;;  %v3380_v7 = vld [vmem:[%s3664_s22 + $0xc8] ss:$68 sps:$4 sm:$0xff]   ;;  %v3385_v8 = vld [vmem:[%s3664_s22 + $0x220] ss:$68 sps:$4 sm:$0xff]   ;;  %v3384_v10 = vld [vmem:[%s3664_s22 + $0x150] ss:$68 sps:$4 sm:$0xff]  }
  0x2a   : > { %794 = vmatpush1.bf16.msra.mxu1 %v3325_v29  ;;  %v3389_v11 = vld [vmem:[%s3664_s22 + $0x2a8] ss:$68 sps:$4 sm:$0xff]   ;;  %v3388_v13 = vld [vmem:[%s3664_s22 + $0x1d8] ss:$68 sps:$4 sm:$0xff]   ;;  %v3395_v15 = vld [vmem:[%s3664_s22 + $0x330] ss:$68 sps:$4 sm:$0xff]  }
  0x2b   : > { %795 = vmatprep.subr.bf16.mxu1 %v3333_v30  ;;  %v3394_v14 = vld [vmem:[%s3664_s22 + $0x22c] ss:$68 sps:$4 sm:$0xff]   ;;  %v3403_v16 = vld [vmem:[%s3664_s22 + $0x3bc] ss:$68 sps:$4 sm:$0xff]   ;;  %v3400_v19 = vld [vmem:[%s3664_s22 + $0x2b4] ss:$68 sps:$4 sm:$0xff]  }
  0x2c   : > { %755 = vmatpush1.bf16.msra.mxu0 %v3315_v27  ;;  %v3392_v17 = vld [vmem:[%s3664_s22 + $0x228] ss:$68 sps:$4 sm:$0xff]   ;;  %v3401_v20 = vld [vmem:[%s3664_s22 + $0x3b8] ss:$68 sps:$4 sm:$0xff]   ;;  %v3787_v22 = vld [vmem:[%s3683_s26 + $0x4] sm:$0xf] }
  0x2d   : > { %756 = vmatprep.subr.bf16.mxu0 %v3321_v28  ;;  %v3412_v21 = vld [vmem:[%s3664_s22 + $0x234] ss:$68 sps:$4 sm:$0xff]   ;;  %v3406_v24 = vld [vmem:[%s3664_s22 + $0x33c] ss:$68 sps:$4 sm:$0xff]   ;;  %v3421_v29 = vld [vmem:[%s3664_s22 + $0x344] ss:$68 sps:$4 sm:$0xff]  }
  0x2e   : > { %796 = vmatpush1.bf16.msra.mxu1 %v3331_v33  ;;  %v3398_v23 = vld [vmem:[%s3664_s22 + $0x2b0] ss:$68 sps:$4 sm:$0xff]   ;;  %v3415_v26 = vld [vmem:[%s3664_s22 + $0x2bc] ss:$68 sps:$4 sm:$0xff]  }
  0x2f   : > { %797 = vmatprep.subr.bf16.mxu1 %v3339_v34  ;;  %v3410_v25 = vld [vmem:[%s3664_s22 + $0x230] ss:$68 sps:$4 sm:$0xff]   ;;  %v3404_v27 = vld [vmem:[%s3664_s22 + $0x338] ss:$68 sps:$4 sm:$0xff]   ;;  %v3407_v30 = vld [vmem:[%s3664_s22 + $0x3c0] ss:$68 sps:$4 sm:$0xff]  }
  0x30   : > { %757 = vmatpush1.bf16.msra.mxu0 %v3319_v31  ;;  %v3413_v28 = vld [vmem:[%s3664_s22 + $0x2b8] ss:$68 sps:$4 sm:$0xff]   ;;  %v3427_v33 = vld [vmem:[%s3664_s22 + $0x3cc] ss:$68 sps:$4 sm:$0xff]  }
  0x31   : > { %832 = vmatprep.subr.bf16.mxu0 %v3330_v32  ;;  %v3418_v31 = vld [vmem:[%s3664_s22 + $0x23c] ss:$68 sps:$4 sm:$0xff]  }
  0x32   : > { %798 = vmatpush1.bf16.msra.mxu1 %v3337_v37  ;;  %v3419_v32 = vld [vmem:[%s3664_s22 + $0x340] ss:$68 sps:$4 sm:$0xff]   ;;  %v3416_v34 = vld [vmem:[%s3664_s22 + $0x238] ss:$68 sps:$4 sm:$0xff]  }
  0x33   : > { %2861 = vmatmul.mubr.msk.bf16.vlgmr.msra.gmra.mrb[4].mxu0 %vm664_vm0, %v3689_v18  ;;  %873 = vmatprep.subr.bf16.mxu1 %v3348_v38  ;;  %v3436_v37 = vld [vmem:[%s3664_s22 + $0x244] ss:$68 sps:$4 sm:$0xff]  }
  0x34   : > { %833 = vmatpush1.bf16.msra.mxu0 %v3328_v35  ;;  %864 = vmatprep.mubr.bf16.mxu0 %v3610_v1  ;;  %v3424_v35 = vld [vmem:[%s3664_s22 + $0x2c4] ss:$68 sps:$4 sm:$0xff]  }
  0x35   : > { %834 = vmatprep.subr.bf16.mxu0 %v3336_v36  ;;  %2862 = vmatmul.mubr.msk.bf16.vlgmr.msra.gmra.mrb[4].mxu1 %vm664_vm0, %v3689_v18  ;;  %v3425_v36 = vld [vmem:[%s3664_s22 + $0x3c8] ss:$68 sps:$4 sm:$0xff]   ;;  %v3422_v38 = vld [vmem:[%s3664_s22 + $0x2c0] ss:$68 sps:$4 sm:$0xff]  }
  0x36   : > { %874 = vmatpush1.bf16.msra.mxu1 %v3346_v41  ;;  %905 = vmatprep.mubr.bf16.mxu1 %v3610_v1  ;;  %v3439_v41 = vld [vmem:[%s3664_s22 + $0x2cc] ss:$68 sps:$4 sm:$0xff]  }
  0x37   : > { %875 = vmatprep.subr.bf16.mxu1 %v3351_v42  ;;  %v3428_v42 = vld [vmem:[%s3664_s22 + $0x348] ss:$68 sps:$4 sm:$0xff]  }
  0x38   : > { %835 = vmatpush1.bf16.msra.mxu0 %v3334_v39  ;;  %v3430_v39 = vld [vmem:[%s3664_s22 + $0x34c] ss:$68 sps:$4 sm:$0xff]  }
  0x39   : > { %836 = vmatprep.subr.bf16.mxu0 %v3342_v40  ;;  %v3434_v40 = vld [vmem:[%s3664_s22 + $0x240] ss:$68 sps:$4 sm:$0xff]  }
  0x3a   : > { %876 = vmatpush1.bf16.msra.mxu1 %v3349_v45  ;;  %v3445_v45 = vld [vmem:[%s3664_s22 + $0x354] ss:$68 sps:$4 sm:$0xff]  }
  0x3b   : > { %877 = vmatprep.subr.bf16.mxu1 %v3357_v46  ;;  %v3431_v46 = vld [vmem:[%s3664_s22 + $0x3d0] ss:$68 sps:$4 sm:$0xff]  }
  0x3c   : > { %837 = vmatpush1.bf16.msra.mxu0 %v3340_v43  ;;  %v3433_v43 = vld [vmem:[%s3664_s22 + $0x3d4] ss:$68 sps:$4 sm:$0xff]  }
  0x3d   : > { %838 = vmatprep.subr.bf16.mxu0 %v3345_v44  ;;  %v3437_v44 = vld [vmem:[%s3664_s22 + $0x2c8] ss:$68 sps:$4 sm:$0xff]  }
  0x3e   : > { %878 = vmatpush1.bf16.msra.mxu1 %v3355_v49  ;;  %v3451_v49 = vld [vmem:[%s3664_s22 + $0x3dc] ss:$68 sps:$4 sm:$0xff]  }
  0x3f   : > { %879 = vmatprep.subr.bf16.mxu1 %v3363_v50  ;;  %v3440_v50 = vld [vmem:[%s3664_s22 + $0x248] ss:$68 sps:$4 sm:$0xff]  }
  0x40   : > { %839 = vmatpush1.bf16.msra.mxu0 %v3343_v47  ;;  %v3442_v47 = vld [vmem:[%s3664_s22 + $0x24c] ss:$68 sps:$4 sm:$0xff]  }
  0x41   : > { %914 = vmatprep.subr.bf16.mxu0 %v3354_v48  ;;  %v3443_v48 = vld [vmem:[%s3664_s22 + $0x350] ss:$68 sps:$4 sm:$0xff]  }
  0x42   : > { %880 = vmatpush1.bf16.msra.mxu1 %v3361_v53  ;;  %v3460_v53 = vld [vmem:[%s3664_s22 + $0x254] ss:$68 sps:$4 sm:$0xff]  }
  0x43   : > { %2863 = vmatmul.mubr.msk.bf16.vlgmr.msra.gmra.mrb[8].mxu0 %vm664_vm0, %v3689_v18  ;;  %955 = vmatprep.subr.bf16.mxu1 %v3372_v54  ;;  %v3446_v54 = vld [vmem:[%s3664_s22 + $0x2d0] ss:$68 sps:$4 sm:$0xff]  }
  0x44   : > { %915 = vmatpush1.bf16.msra.mxu0 %v3352_v51  ;;  %946 = vmatprep.mubr.bf16.mxu0 %v3610_v1  ;;  %v3448_v51 = vld [vmem:[%s3664_s22 + $0x2d4] ss:$68 sps:$4 sm:$0xff]  }
  0x45   : > { %916 = vmatprep.subr.bf16.mxu0 %v3360_v52  ;;  %2864 = vmatmul.mubr.msk.bf16.vlgmr.msra.gmra.mrb[8].mxu1 %vm664_vm0, %v3689_v18  ;;  %v3449_v52 = vld [vmem:[%s3664_s22 + $0x3d8] ss:$68 sps:$4 sm:$0xff]  }
  0x46   : > { %956 = vmatpush1.bf16.msra.mxu1 %v3370_v57  ;;  %987 = vmatprep.mubr.bf16.mxu1 %v3610_v1  ;;  %v3463_v57 = vld [vmem:[%s3664_s22 + $0x2dc] ss:$68 sps:$4 sm:$0xff]  }
  0x47   : > { %957 = vmatprep.subr.bf16.mxu1 %v3375_v58  ;;  %v3452_v58 = vld [vmem:[%s3664_s22 + $0x358] ss:$68 sps:$4 sm:$0xff]  }
  0x48   : > { %917 = vmatpush1.bf16.msra.mxu0 %v3358_v55  ;;  %v3454_v55 = vld [vmem:[%s3664_s22 + $0x35c] ss:$68 sps:$4 sm:$0xff]  }
  0x49   : > { %918 = vmatprep.subr.bf16.mxu0 %v3366_v56  ;;  %v3458_v56 = vld [vmem:[%s3664_s22 + $0x250] ss:$68 sps:$4 sm:$0xff]  }
  0x4a   : > { %958 = vmatpush1.bf16.msra.mxu1 %v3373_v61  ;;  %v3469_v61 = vld [vmem:[%s3664_s22 + $0x364] ss:$68 sps:$4 sm:$0xff]  }
  0x4b   : > { %959 = vmatprep.subr.bf16.mxu1 %v3379_v62  ;;  %v3455_v62 = vld [vmem:[%s3664_s22 + $0x3e0] ss:$68 sps:$4 sm:$0xff]  }
  0x4c   : > { %919 = vmatpush1.bf16.msra.mxu0 %v3364_v59  ;;  %v3457_v59 = vld [vmem:[%s3664_s22 + $0x3e4] ss:$68 sps:$4 sm:$0xff]  }
  0x4d   : > { %920 = vmatprep.subr.bf16.mxu0 %v3369_v60  ;;  %v3461_v60 = vld [vmem:[%s3664_s22 + $0x2d8] ss:$68 sps:$4 sm:$0xff]  }
  0x4e   : > { %960 = vmatpush1.bf16.msra.mxu1 %v3377_v0  ;;  %v3467_v0 = vld [vmem:[%s3664_s22 + $0x360] ss:$68 sps:$4 sm:$0xff]  }
  0x4f   : > { %961 = vmatprep.subr.bf16.mxu1 %v3383_v2  ;;  %v3475_v2 = vld [vmem:[%s3664_s22 + $0x3ec] ss:$68 sps:$4 sm:$0xff]  }
  0x50   : > { %921 = vmatpush1.bf16.msra.mxu0 %v3367_v63  ;;  %v3466_v63 = vld [vmem:[%s3664_s22 + $0x25c] ss:$68 sps:$4 sm:$0xff]  }
  0x51   : > { %3219 = vmatprep.subr.bf16.mxu0 %v3611_v4 }
  0x52   : > { %962 = vmatpush1.bf16.msra.mxu1 %v3381_v5  ;;  %v3472_v5 = vld [vmem:[%s3664_s22 + $0x2e4] ss:$68 sps:$4 sm:$0xff]  }
  0x53   : > { %2865 = vmatmul.mubr.msk.bf16.vlgmr.msra.gmra.mrb[12].mxu0 %vm664_vm0, %v3689_v18  ;;  %1481 = vmatprep.subr.bf16.mxu1 %v3387_v6  ;;  %v3473_v6 = vld [vmem:[%s3664_s22 + $0x3e8] ss:$68 sps:$4 sm:$0xff]  }
  0x54   : > { %3220 = vmatpush3.bf16.msra.mxu0 %v3376_v3  ;;  %3227 = vmatprep.mubr.msk.bf16.mxu0 %vm3612_vm1, %v3611_v4  ;;  %v3464_v3 = vld [vmem:[%s3664_s22 + $0x258] ss:$68 sps:$4 sm:$0xff]  }
  0x55   : > { %3221 = vmatprep.subr.bf16.mxu0 %v3611_v4  ;;  %2866 = vmatmul.mubr.msk.bf16.vlgmr.msra.gmra.mrb[12].mxu1 %vm664_vm0, %v3689_v18 }
  0x56   : > { %1482 = vmatpush1.bf16.msra.mxu1 %v3385_v8  ;;  %1513 = vmatprep.mubr.bf16.mxu1 %v3610_v1  ;;  %v3478_v8 = vld [vmem:[%s3664_s22 + $0x36c] ss:$68 sps:$4 sm:$0xff]  }
  0x57   : > { %1483 = vmatprep.subr.bf16.mxu1 %v3391_v9  ;;  %v3482_v9 = vld [vmem:[%s3664_s22 + $0x260] ss:$68 sps:$4 sm:$0xff]  }
  0x58   : > { %3222 = vmatpush3.bf16.msra.mxu0 %v3380_v7  ;;  %v3470_v7 = vld [vmem:[%s3664_s22 + $0x2e0] ss:$68 sps:$4 sm:$0xff]  }
  0x59   : > { %3223 = vmatprep.subr.bf16.mxu0 %v3611_v4 }
  0x5a   : > { %1484 = vmatpush1.bf16.msra.mxu1 %v3389_v11  ;;  %v3481_v11 = vld [vmem:[%s3664_s22 + $0x3f4] ss:$68 sps:$4 sm:$0xff]  }
  0x5b   : > { %1485 = vmatprep.subr.bf16.mxu1 %v3397_v12  ;;  %v3486_v12 = vld [vmem:[%s3664_s22 + $0x2e8] ss:$68 sps:$4 sm:$0xff]  }
  0x5c   : > { %3224 = vmatpush3.bf16.msra.mxu0 %v3384_v10  ;;  %v3476_v10 = vld [vmem:[%s3664_s22 + $0x368] ss:$68 sps:$4 sm:$0xff]  }
  0x5d   : > { %3225 = vmatprep.subr.bf16.mxu0 %v3611_v4 }
  0x5e   : > { %1486 = vmatpush1.bf16.msra.mxu1 %v3395_v15  ;;  %v3490_v15 = vld [vmem:[%s3664_s22 + $0x370] ss:$68 sps:$4 sm:$0xff]  }
  0x5f   : > { %1487 = vmatprep.subr.bf16.mxu1 %v3403_v16  ;;  %v3483_v16 = vld [vmem:[%s3664_s22 + $0x440] ss:$68 sps:$4 sm:$0xff]  }
  0x60   : > { %3226 = vmatpush3.bf16.msra.mxu0 %v3388_v13  ;;  %v3479_v13 = vld [vmem:[%s3664_s22 + $0x3f0] ss:$68 sps:$4 sm:$0xff]  }
  0x61   : > { %1522 = vmatprep.subr.bf16.mxu0 %v3394_v14  ;;  %v3485_v14 = vld [vmem:[%s3664_s22 + $0x444] ss:$68 sps:$4 sm:$0xff]  }
  0x62   : > { %1488 = vmatpush1.bf16.msra.mxu1 %v3401_v20  ;;  %v3500_v20 = vld [vmem:[%s3664_s22 + $0x44c] ss:$68 sps:$4 sm:$0xff]  }
  0x63   : > { %3228 = vmatmul.mubr.msk.bf16.vlgmr.msra.gmra.mrb[16].mxu0 %vm664_vm0, %v3689_v18  ;;  %1563 = vmatprep.subr.bf16.mxu1 %v3412_v21  ;;  %v3409_v18 = vld [vmem:[%s3664_s22 + $0x3c4] ss:$68 sps:$4 sm:$0xff]  }
  0x64   : > { %1523 = vmatpush1.bf16.msra.mxu0 %v3392_v17  ;;  %1554 = vmatprep.mubr.bf16.mxu0 %v3610_v1  ;;  %v3489_v17 = vld [vmem:[%s3664_s22 + $0x4cc] ss:$68 sps:$4 sm:$0xff]  }
  0x65   : > { %1524 = vmatprep.subr.bf16.mxu0 %v3400_v19  ;;  %3009 = vmatmul.mubr.msk.bf16.vlgmr.msra.gmra.mrb[16].mxu1 %vm664_vm0, %v3787_v22  ;;  %v3494_v19 = vld [vmem:[%s3664_s22 + $0x3f8] ss:$68 sps:$4 sm:$0xff]   ;;  %v3487_v21 = vld [vmem:[%s3664_s22 + $0x4c8] ss:$68 sps:$4 sm:$0xff]  }
  0x66   : > { %1564 = vmatpush1.bf16.msra.mxu1 %v3410_v25  ;;  %1595 = vmatprep.mubr.bf16.mxu1 %v3610_v1  ;;  %v3503_v25 = vld [vmem:[%s3664_s22 + $0x4d4] ss:$68 sps:$4 sm:$0xff]  }
  0x67   : > { %1565 = vmatprep.subr.bf16.mxu1 %v3415_v26  ;;  %v3491_v26 = vld [vmem:[%s3664_s22 + $0x550] ss:$68 sps:$4 sm:$0xff]  }
  0x68   : > { %1525 = vmatpush1.bf16.msra.mxu0 %v3398_v23  ;;  %v3493_v23 = vld [vmem:[%s3664_s22 + $0x554] ss:$68 sps:$4 sm:$0xff]  }
  0x69   : > { %1526 = vmatprep.subr.bf16.mxu0 %v3406_v24  ;;  %v3498_v24 = vld [vmem:[%s3664_s22 + $0x448] ss:$68 sps:$4 sm:$0xff]  }
  0x6a   : > { %1566 = vmatpush1.bf16.msra.mxu1 %v3413_v28  ;;  %v3509_v28 = vld [vmem:[%s3664_s22 + $0x55c] ss:$68 sps:$4 sm:$0xff]  }
  0x6b   : > { %1567 = vmatprep.subr.bf16.mxu1 %v3421_v29  ;;  %v3495_v29 = vld [vmem:[%s3664_s22 + $0x5d8] ss:$68 sps:$4 sm:$0xff]  }
  0x6c   : > { %1527 = vmatpush1.bf16.msra.mxu0 %v3404_v27  ;;  %v3497_v27 = vld [vmem:[%s3664_s22 + $0x5dc] ss:$68 sps:$4 sm:$0xff]  }
  0x6d   : > { %1528 = vmatprep.subr.bf16.mxu0 %v3409_v18  ;;  %v3501_v18 = vld [vmem:[%s3664_s22 + $0x4d0] ss:$68 sps:$4 sm:$0xff]  }
  0x6e   : > { %1568 = vmatpush1.bf16.msra.mxu1 %v3419_v32  ;;  %v3895_v32 = vld [vmem:[%s3683_s26 + $0x8] sm:$0xf] }
  0x6f   : > { %1569 = vmatprep.subr.bf16.mxu1 %v3427_v33  ;;  %v3504_v33 = vld [vmem:[%s3664_s22 + $0x450] ss:$68 sps:$4 sm:$0xff]  }
  0x70   : > { %1529 = vmatpush1.bf16.msra.mxu0 %v3407_v30  ;;  %v3506_v30 = vld [vmem:[%s3664_s22 + $0x454] ss:$68 sps:$4 sm:$0xff]  }
  0x71   : > { %1604 = vmatprep.subr.bf16.mxu0 %v3418_v31  ;;  %v3515_v31 = vld [vmem:[%s3664_s22 + $0x5e4] ss:$68 sps:$4 sm:$0xff]  }
  0x72   : > { %1570 = vmatpush1.bf16.msra.mxu1 %v3425_v36  ;;  %v3524_v36 = vld [vmem:[%s3664_s22 + $0x45c] ss:$68 sps:$4 sm:$0xff]  }
  0x73   : > { %3010 = vmatmul.mubr.msk.bf16.vlgmr.msra.gmra.mrb[20].mxu0 %vm664_vm0, %v3787_v22  ;;  %1645 = vmatprep.subr.bf16.mxu1 %v3436_v37  ;;  %v3510_v37 = vld [vmem:[%s3664_s22 + $0x4d8] ss:$68 sps:$4 sm:$0xff]  }
  0x74   : > { %1605 = vmatpush1.bf16.msra.mxu0 %v3416_v34  ;;  %1636 = vmatprep.mubr.bf16.mxu0 %v3610_v1  ;;  %v3512_v34 = vld [vmem:[%s3664_s22 + $0x4dc] ss:$68 sps:$4 sm:$0xff]  }
  0x75   : > { %1606 = vmatprep.subr.bf16.mxu0 %v3424_v35  ;;  %3011 = vmatmul.mubr.msk.bf16.vlgmr.msra.gmra.mrb[20].mxu1 %vm664_vm0, %v3787_v22  ;;  %v3513_v35 = vld [vmem:[%s3664_s22 + $0x5e0] ss:$68 sps:$4 sm:$0xff]  }
  0x76   : > { %1646 = vmatpush1.bf16.msra.mxu1 %v3434_v40  ;;  %1677 = vmatprep.mubr.bf16.mxu1 %v3610_v1  ;;  %v3527_v40 = vld [vmem:[%s3664_s22 + $0x4e4] ss:$68 sps:$4 sm:$0xff]  }
  0x77   : > { %1647 = vmatprep.subr.bf16.mxu1 %v3439_v41  ;;  %v3516_v41 = vld [vmem:[%s3664_s22 + $0x560] ss:$68 sps:$4 sm:$0xff]  }
  0x78   : > { %1607 = vmatpush1.bf16.msra.mxu0 %v3422_v38  ;;  %v3518_v38 = vld [vmem:[%s3664_s22 + $0x564] ss:$68 sps:$4 sm:$0xff]  }
  0x79   : > { %1608 = vmatprep.subr.bf16.mxu0 %v3430_v39  ;;  %v3522_v39 = vld [vmem:[%s3664_s22 + $0x458] ss:$68 sps:$4 sm:$0xff]  }
  0x7a   : > { %1648 = vmatpush1.bf16.msra.mxu1 %v3437_v44  ;;  %v3533_v44 = vld [vmem:[%s3664_s22 + $0x56c] ss:$68 sps:$4 sm:$0xff]  }
  0x7b   : > { %1649 = vmatprep.subr.bf16.mxu1 %v3445_v45  ;;  %v3519_v45 = vld [vmem:[%s3664_s22 + $0x5e8] ss:$68 sps:$4 sm:$0xff]  }
  0x7c   : > { %1609 = vmatpush1.bf16.msra.mxu0 %v3428_v42  ;;  %v3521_v42 = vld [vmem:[%s3664_s22 + $0x5ec] ss:$68 sps:$4 sm:$0xff]  }
  0x7d   : > { %1610 = vmatprep.subr.bf16.mxu0 %v3433_v43  ;;  %v3525_v43 = vld [vmem:[%s3664_s22 + $0x4e0] ss:$68 sps:$4 sm:$0xff]  }
  0x7e   : > { %1650 = vmatpush1.bf16.msra.mxu1 %v3443_v48  ;;  %v3539_v48 = vld [vmem:[%s3664_s22 + $0x5f4] ss:$68 sps:$4 sm:$0xff]  }
  0x7f   : > { %1651 = vmatprep.subr.bf16.mxu1 %v3451_v49  ;;  %v3528_v49 = vld [vmem:[%s3664_s22 + $0x460] ss:$68 sps:$4 sm:$0xff]  }
  0x80   : > { %1611 = vmatpush1.bf16.msra.mxu0 %v3431_v46  ;;  %v3530_v46 = vld [vmem:[%s3664_s22 + $0x464] ss:$68 sps:$4 sm:$0xff]  }
  0x81   : > { %1686 = vmatprep.subr.bf16.mxu0 %v3442_v47  ;;  %v3531_v47 = vld [vmem:[%s3664_s22 + $0x568] ss:$68 sps:$4 sm:$0xff]  }
  0x82   : > { %1652 = vmatpush1.bf16.msra.mxu1 %v3449_v52  ;;  %v3548_v52 = vld [vmem:[%s3664_s22 + $0x46c] ss:$68 sps:$4 sm:$0xff]  }
  0x83   : > { %3012 = vmatmul.mubr.msk.bf16.vlgmr.msra.gmra.mrb[24].mxu0 %vm664_vm0, %v3787_v22  ;;  %1727 = vmatprep.subr.bf16.mxu1 %v3460_v53  ;;  %v3534_v53 = vld [vmem:[%s3664_s22 + $0x4e8] ss:$68 sps:$4 sm:$0xff]  }
  0x84   : > { %1687 = vmatpush1.bf16.msra.mxu0 %v3440_v50  ;;  %1718 = vmatprep.mubr.bf16.mxu0 %v3610_v1  ;;  %v3536_v50 = vld [vmem:[%s3664_s22 + $0x4ec] ss:$68 sps:$4 sm:$0xff]  }
  0x85   : > { %1688 = vmatprep.subr.bf16.mxu0 %v3448_v51  ;;  %3013 = vmatmul.mubr.msk.bf16.vlgmr.msra.gmra.mrb[24].mxu1 %vm664_vm0, %v3787_v22  ;;  %v3537_v51 = vld [vmem:[%s3664_s22 + $0x5f0] ss:$68 sps:$4 sm:$0xff]  }
  0x86   : > { %1728 = vmatpush1.bf16.msra.mxu1 %v3458_v56  ;;  %1759 = vmatprep.mubr.bf16.mxu1 %v3610_v1  ;;  %v3551_v56 = vld [vmem:[%s3664_s22 + $0x4f4] ss:$68 sps:$4 sm:$0xff]  }
  0x87   : > { %1729 = vmatprep.subr.bf16.mxu1 %v3463_v57  ;;  %v3540_v57 = vld [vmem:[%s3664_s22 + $0x570] ss:$68 sps:$4 sm:$0xff]  }
  0x88   : > { %1689 = vmatpush1.bf16.msra.mxu0 %v3446_v54  ;;  %v3542_v54 = vld [vmem:[%s3664_s22 + $0x574] ss:$68 sps:$4 sm:$0xff]  }
  0x89   : > { %1690 = vmatprep.subr.bf16.mxu0 %v3454_v55  ;;  %v3546_v55 = vld [vmem:[%s3664_s22 + $0x468] ss:$68 sps:$4 sm:$0xff]  }
  0x8a   : > { %1730 = vmatpush1.bf16.msra.mxu1 %v3461_v60  ;;  %v3557_v60 = vld [vmem:[%s3664_s22 + $0x57c] ss:$68 sps:$4 sm:$0xff]  }
  0x8b   : > { %1731 = vmatprep.subr.bf16.mxu1 %v3469_v61  ;;  %v3543_v61 = vld [vmem:[%s3664_s22 + $0x5f8] ss:$68 sps:$4 sm:$0xff]  }
  0x8c   : > { %1691 = vmatpush1.bf16.msra.mxu0 %v3452_v58  ;;  %v3545_v58 = vld [vmem:[%s3664_s22 + $0x5fc] ss:$68 sps:$4 sm:$0xff]  }
  0x8d   : > { %1692 = vmatprep.subr.bf16.mxu0 %v3457_v59  ;;  %v3549_v59 = vld [vmem:[%s3664_s22 + $0x4f0] ss:$68 sps:$4 sm:$0xff]  }
  0x8e   : > { %1732 = vmatpush1.bf16.msra.mxu1 %v3467_v0  ;;  %v3563_v0 = vld [vmem:[%s3664_s22 + $0x604] ss:$68 sps:$4 sm:$0xff]  }
  0x8f   : > { %1733 = vmatprep.subr.bf16.mxu1 %v3475_v2  ;;  %v3552_v2 = vld [vmem:[%s3664_s22 + $0x470] ss:$68 sps:$4 sm:$0xff]  }
  0x90   : > { %1693 = vmatpush1.bf16.msra.mxu0 %v3455_v62  ;;  %v3554_v62 = vld [vmem:[%s3664_s22 + $0x474] ss:$68 sps:$4 sm:$0xff]  }
  0x91   : > { %1768 = vmatprep.subr.bf16.mxu0 %v3466_v63  ;;  %v3555_v63 = vld [vmem:[%s3664_s22 + $0x578] ss:$68 sps:$4 sm:$0xff]  }
  0x92   : > { %1734 = vmatpush1.bf16.msra.mxu1 %v3473_v6  ;;  %v3572_v6 = vld [vmem:[%s3664_s22 + $0x47c] ss:$68 sps:$4 sm:$0xff]  }
  0x93   : > { %3014 = vmatmul.mubr.msk.bf16.vlgmr.msra.gmra.mrb[28].mxu0 %vm664_vm0, %v3787_v22  ;;  %3231 = vmatprep.subr.bf16.mxu1 %v3611_v4 }
  0x94   : > { %1769 = vmatpush1.bf16.msra.mxu0 %v3464_v3  ;;  %1800 = vmatprep.mubr.bf16.mxu0 %v3610_v1  ;;  %v3560_v3 = vld [vmem:[%s3664_s22 + $0x4fc] ss:$68 sps:$4 sm:$0xff]  }
  0x95   : > { %1770 = vmatprep.subr.bf16.mxu0 %v3472_v5  ;;  %3015 = vmatmul.mubr.msk.bf16.vlgmr.msra.gmra.mrb[28].mxu1 %vm664_vm0, %v3787_v22  ;;  %v3561_v5 = vld [vmem:[%s3664_s22 + $0x600] ss:$68 sps:$4 sm:$0xff]  }
  0x96   : > { %3232 = vmatpush3.bf16.msra.mxu1 %v3482_v9  ;;  %3239 = vmatprep.mubr.msk.bf16.mxu1 %vm3612_vm1, %v3611_v4  ;;  %v3570_v9 = vld [vmem:[%s3664_s22 + $0x478] ss:$68 sps:$4 sm:$0xff]  }
  0x97   : > { %3233 = vmatprep.subr.bf16.mxu1 %v3611_v4 }
  0x98   : > { %1771 = vmatpush1.bf16.msra.mxu0 %v3470_v7  ;;  %v3558_v7 = vld [vmem:[%s3664_s22 + $0x4f8] ss:$68 sps:$4 sm:$0xff]  }
  0x99   : > { %1772 = vmatprep.subr.bf16.mxu0 %v3478_v8  ;;  %v3566_v8 = vld [vmem:[%s3664_s22 + $0x584] ss:$68 sps:$4 sm:$0xff]  }
  0x9a   : > { %3234 = vmatpush3.bf16.msra.mxu1 %v3486_v12  ;;  %v3569_v12 = vld [vmem:[%s3664_s22 + $0x60c] ss:$68 sps:$4 sm:$0xff]  }
  0x9b   : > { %3235 = vmatprep.subr.bf16.mxu1 %v3611_v4 }
  0x9c   : > { %1773 = vmatpush1.bf16.msra.mxu0 %v3476_v10  ;;  %v3575_v10 = vld [vmem:[%s3664_s22 + $0x504] ss:$68 sps:$4 sm:$0xff]  }
  0x9d   : > { %1774 = vmatprep.subr.bf16.mxu0 %v3481_v11  ;;  %v3564_v11 = vld [vmem:[%s3664_s22 + $0x580] ss:$68 sps:$4 sm:$0xff]  }
  0x9e   : > { %3236 = vmatpush3.bf16.msra.mxu1 %v3490_v15  ;;  %v3567_v15 = vld [vmem:[%s3664_s22 + $0x608] ss:$68 sps:$4 sm:$0xff]  }
  0x9f   : > { %3237 = vmatprep.subr.bf16.mxu1 %v3611_v4 }
  0xa0   : > { %1775 = vmatpush1.bf16.msra.mxu0 %v3479_v13  ;;  %v3573_v13 = vld [vmem:[%s3664_s22 + $0x500] ss:$68 sps:$4 sm:$0xff]  }
  0xa1   : > { %2295 = vmatprep.subr.bf16.mxu0 %v3485_v14  ;;  %v3579_v14 = vld [vmem:[%s3664_s22 + $0x58c] ss:$68 sps:$4 sm:$0xff]  }
  0xa2   : > { %3238 = vmatpush3.bf16.msra.mxu1 %v3494_v19  ;;  %v3576_v19 = vld [vmem:[%s3664_s22 + $0x480] ss:$68 sps:$4 sm:$0xff]  }
  0xa3   : > { %3016 = vmatmul.mubr.msk.bf16.vlgmr.msra.gmra.mrb[32].mxu0 %vm664_vm0, %v3787_v22  ;;  %2336 = vmatprep.subr.bf16.mxu1 %v3500_v20  ;;  %v3581_v20 = vld [vmem:[%s3664_s22 + $0x610] ss:$68 sps:$4 sm:$0xff]  }
  0xa4   : > { %2296 = vmatpush1.bf16.msra.mxu0 %v3483_v16  ;;  %2327 = vmatprep.mubr.bf16.mxu0 %v3610_v1  ;;  %v3577_v16 = vld [vmem:[%s3664_s22 + $0x588] ss:$68 sps:$4 sm:$0xff]  }
  0xa5   : > { %2297 = vmatprep.subr.bf16.mxu0 %v3489_v17  ;;  %3240 = vmatmul.mubr.msk.bf16.vlgmr.msra.gmra.mrb[32].mxu1 %vm664_vm0, %v3787_v22  ;;  %v3507_v22 = vld [vmem:[%s3664_s22 + $0x558] ss:$68 sps:$4 sm:$0xff]  }
  0xa6   : > { %2337 = vmatpush1.bf16.msra.mxu1 %v3498_v24  ;;  %2368 = vmatprep.mubr.bf16.mxu1 %v3610_v1  ;;  %v3583_v17 = vld [vmem:[%s3664_s22 + $0x614] ss:$68 sps:$4 sm:$0xff]   ;;  %v3980_v24 = vpop.permute.xlu0 %317 }
  0xa7   : > { %2338 = vmatprep.subr.bf16.mxu1 %v3503_v25 }
  0xa8   : > { %2298 = vmatpush1.bf16.msra.mxu0 %v3487_v21  ;;  %v3584_v21 = vld [vmem:[%s3664_s22 + $0x590] ss:$68 sps:$4 sm:$0xff]  }
  0xa9   : > { %2299 = vmatprep.subr.bf16.mxu0 %v3493_v23  ;;  %v3585_v23 = vld [vmem:[%s3664_s22 + $0x618] ss:$68 sps:$4 sm:$0xff]  }
  0xaa   : > { %2339 = vmatpush1.bf16.msra.mxu1 %v3501_v18 }
  0xab   : > { %2340 = vmatprep.subr.bf16.mxu1 %v3509_v28 }
  0xac   : > { %2300 = vmatpush1.bf16.msra.mxu0 %v3491_v26 }
  0xad   : > { %2301 = vmatprep.subr.bf16.mxu0 %v3497_v27 }
  0xae   : > { %2341 = vmatpush1.bf16.msra.mxu1 %v3507_v22 }
  0xaf   : > { %2342 = vmatprep.subr.bf16.mxu1 %v3515_v31 }
  0xb0   : > { %2302 = vmatpush1.bf16.msra.mxu0 %v3495_v29 }
  0xb1   : > { %2377 = vmatprep.subr.bf16.mxu0 %v3506_v30 }
  0xb2   : > { %2343 = vmatpush1.bf16.msra.mxu1 %v3513_v35 }
  0xb3   : > { %3176 = vmatmul.mubr.msk.bf16.vlgmr.msra.gmra.mrb[36].mxu0 %vm664_vm0, %v3895_v32  ;;  %2418 = vmatprep.subr.bf16.mxu1 %v3524_v36 }
  0xb4   : > { %2378 = vmatpush1.bf16.msra.mxu0 %v3504_v33  ;;  %2409 = vmatprep.mubr.bf16.mxu0 %v3610_v1 }
  0xb5   : > { %2379 = vmatprep.subr.bf16.mxu0 %v3512_v34  ;;  %3177 = vmatmul.mubr.msk.bf16.vlgmr.msra.gmra.mrb[36].mxu1 %vm664_vm0, %v3895_v32 }
  0xb6   : > { %2419 = vmatpush1.bf16.msra.mxu1 %v3522_v39  ;;  %2450 = vmatprep.mubr.bf16.mxu1 %v3610_v1 }
  0xb7   : > { %2420 = vmatprep.subr.bf16.mxu1 %v3527_v40 }
  0xb8   : > { %2380 = vmatpush1.bf16.msra.mxu0 %v3510_v37 }
  0xb9   : > { %2381 = vmatprep.subr.bf16.mxu0 %v3518_v38 }
  0xba   : > { %2421 = vmatpush1.bf16.msra.mxu1 %v3525_v43 }
  0xbb   : > { %2422 = vmatprep.subr.bf16.mxu1 %v3533_v44 }
  0xbc   : > { %2382 = vmatpush1.bf16.msra.mxu0 %v3516_v41 }
  0xbd   : > { %2383 = vmatprep.subr.bf16.mxu0 %v3521_v42 }
  0xbe   : > { %2423 = vmatpush1.bf16.msra.mxu1 %v3531_v47 }
  0xbf   : > { %2424 = vmatprep.subr.bf16.mxu1 %v3539_v48 }
  0xc0   : > { %2384 = vmatpush1.bf16.msra.mxu0 %v3519_v45 }
  0xc1   : > { %2459 = vmatprep.subr.bf16.mxu0 %v3530_v46 }
  0xc2   : > { %2425 = vmatpush1.bf16.msra.mxu1 %v3537_v51 }
  0xc3   : > { %3178 = vmatmul.mubr.msk.bf16.vlgmr.msra.gmra.mrb[40].mxu0 %vm664_vm0, %v3895_v32  ;;  %2500 = vmatprep.subr.bf16.mxu1 %v3548_v52 }
  0xc4   : > { %2460 = vmatpush1.bf16.msra.mxu0 %v3528_v49  ;;  %2491 = vmatprep.mubr.bf16.mxu0 %v3610_v1 }
  0xc5   : > { %2461 = vmatprep.subr.bf16.mxu0 %v3536_v50  ;;  %3179 = vmatmul.mubr.msk.bf16.vlgmr.msra.gmra.mrb[40].mxu1 %vm664_vm0, %v3895_v32 }
  0xc6   : > { %2501 = vmatpush1.bf16.msra.mxu1 %v3546_v55  ;;  %2532 = vmatprep.mubr.bf16.mxu1 %v3610_v1 }
  0xc7   : > { %2502 = vmatprep.subr.bf16.mxu1 %v3551_v56 }
  0xc8   : > { %2462 = vmatpush1.bf16.msra.mxu0 %v3534_v53 }
  0xc9   : > { %2463 = vmatprep.subr.bf16.mxu0 %v3542_v54 }
  0xca   : > { %2503 = vmatpush1.bf16.msra.mxu1 %v3549_v59 }
  0xcb   : > { %2504 = vmatprep.subr.bf16.mxu1 %v3557_v60 }
  0xcc   : > { %2464 = vmatpush1.bf16.msra.mxu0 %v3540_v57 }
  0xcd   : > { %2465 = vmatprep.subr.bf16.mxu0 %v3545_v58 }
  0xce   : > { %2505 = vmatpush1.bf16.msra.mxu1 %v3555_v63 }
  0xcf   : > { %2506 = vmatprep.subr.bf16.mxu1 %v3563_v0 }
  0xd0   : > { %2466 = vmatpush1.bf16.msra.mxu0 %v3543_v61 }
  0xd1   : > { %2541 = vmatprep.subr.bf16.mxu0 %v3554_v62 }
  0xd2   : > { %2507 = vmatpush1.bf16.msra.mxu1 %v3561_v5 }
  0xd3   : > { %3180 = vmatmul.mubr.msk.bf16.vlgmr.msra.gmra.mrb[44].mxu0 %vm664_vm0, %v3895_v32  ;;  %2582 = vmatprep.subr.bf16.mxu1 %v3572_v6 }
  0xd4   : > { %2542 = vmatpush1.bf16.msra.mxu0 %v3552_v2  ;;  %2573 = vmatprep.mubr.bf16.mxu0 %v3610_v1 }
  0xd5   : > { %2543 = vmatprep.subr.bf16.mxu0 %v3560_v3  ;;  %3181 = vmatmul.mubr.msk.bf16.vlgmr.msra.gmra.mrb[44].mxu1 %vm664_vm0, %v3895_v32 }
  0xd6   : > { %2583 = vmatpush1.bf16.msra.mxu1 %v3570_v9  ;;  %2614 = vmatprep.mubr.bf16.mxu1 %v3610_v1  ;;  %v3580_v1 = vld [vmem:[%s3664_s22 + $0x508] ss:$68 sps:$4 sm:$0xff]  }
  0xd7   : > { %2584 = vmatprep.subr.bf16.mxu1 %v3575_v10 }
  0xd8   : > { %2544 = vmatpush1.bf16.msra.mxu0 %v3558_v7 }
  0xd9   : > { %2545 = vmatprep.subr.bf16.mxu0 %v3566_v8 }
  0xda   : > { %2585 = vmatpush1.bf16.msra.mxu1 %v3573_v13  ;;  %v4021_v13 = vpop.permute.xlu0 %1131 }
  0xdb   : > { %2586 = vmatprep.subr.bf16.mxu1 %v3579_v14 }
  0xdc   : > { %2546 = vmatpush1.bf16.msra.mxu0 %v3564_v11 }
  0xdd   : > { %2547 = vmatprep.subr.bf16.mxu0 %v3569_v12 }
  0xde   : > { %2587 = vmatpush1.bf16.msra.mxu1 %v3577_v16 }
  0xdf   : > { %2588 = vmatprep.subr.bf16.mxu1 %v3583_v17 }
  0xe0   : > { %2548 = vmatpush1.bf16.msra.mxu0 %v3567_v15 }
  0xe1   : > { %3243 = vmatprep.subr.bf16.mxu0 %v3611_v4 }
  0xe2   : > { %2589 = vmatpush1.bf16.msra.mxu1 %v3581_v20 }
  0xe3   : > { %3182 = vmatmul.mubr.msk.bf16.vlgmr.msra.gmra.mrb[48].mxu0 %vm664_vm0, %v3895_v32 }
  0xe4   : > { %3244 = vmatpush3.bf16.msra.mxu0 %v3576_v19  ;;  %3251 = vmatprep.mubr.msk.bf16.mxu0 %vm3612_vm1, %v3611_v4 }
  0xe5   : > { %3245 = vmatprep.subr.bf16.mxu0 %v3611_v4  ;;  %3183 = vmatmul.mubr.msk.bf16.vlgmr.msra.gmra.mrb[48].mxu1 %vm664_vm0, %v3895_v32 }
  0xe8   : > { %3246 = vmatpush3.bf16.msra.mxu0 %v3580_v1 }
  0xe9   : > { %3247 = vmatprep.subr.bf16.mxu0 %v3611_v4 }
  0xec   : > { %3248 = vmatpush3.bf16.msra.mxu0 %v3584_v21 }
  0xed   : > { %3249 = vmatprep.subr.bf16.mxu0 %v3611_v4 }
  0xf0   : > { %3250 = vmatpush3.bf16.msra.mxu0 %v3585_v23 }
  0xf3   : > { %3252 = vmatmul.mubr.msk.bf16.vlgmr.msra.gmra.mrb[52].mxu0 %vm664_vm0, %v3895_v32 }
  0xf6   : > { %v702_v25 = vpop.f32.mrb[0].mxu0 }
  0xf7   : > { %v703_v26 = vadd.f32 %v702_v25, %v3980_v24  ;;  %v704_v4 = vpop.f32.mrb[1].mxu0 }
  0xf8   : > { %v705_v27 = vadd.f32 %v704_v4, %v3980_v24  ;;  %v706_v18 = vpop.f32.mrb[2].mxu0  ;;  %v743_v29 = vpop.f32.mrb[0].mxu1 }
  0xf9   : > { %1036 = vst [vmem:[%s3985_s30] sm:$0xff] %v703_v26  ;;  %v707_v28 = vpop.f32.mrb[3].mxu0  ;;  %v744_v30 = vadd.f32 %v743_v29, %v3980_v24  ;;  %v745_v22 = vpop.f32.mrb[1].mxu1 }
  0xfa   : > { %1037 = vst [vmem:[%s3985_s30 + $0x8] sm:$0xff] %v705_v27  ;;  %v746_v31 = vadd.f32 %v745_v22, %v3980_v24  ;;  %v747_v32 = vpop.f32.mrb[2].mxu1 }
  0xfb   : > { %1038 = vst [vmem:[%s3985_s30 + $0x10] sm:$0xff] %v744_v30  ;;  %v748_v33 = vpop.f32.mrb[3].mxu1 }
  0xfc   : > { %1039 = vst [vmem:[%s3985_s30 + $0x18] sm:$0xff] %v746_v31 }
 0x106   : > { %v784_v34 = vpop.f32.mrb[4].mxu0 }
 0x107   : > { %v785_v35 = vadd.f32 %v784_v34, %v3980_v24  ;;  %v786_v36 = vpop.f32.mrb[5].mxu0 }
 0x108   : > { %v787_v37 = vadd.f32 %v786_v36, %v3980_v24  ;;  %v788_v38 = vpop.f32.mrb[6].mxu0  ;;  %v825_v40 = vpop.f32.mrb[4].mxu1 }
 0x109   : > { %1040 = vst [vmem:[%s3985_s30 + $0x20] sm:$0xff] %v785_v35  ;;  %v789_v39 = vpop.f32.mrb[7].mxu0  ;;  %v826_v41 = vadd.f32 %v825_v40, %v3980_v24  ;;  %v827_v42 = vpop.f32.mrb[5].mxu1 }
 0x10a   : > { %1041 = vst [vmem:[%s3985_s30 + $0x28] sm:$0xff] %v787_v37  ;;  %v828_v43 = vadd.f32 %v827_v42, %v3980_v24  ;;  %v829_v44 = vpop.f32.mrb[6].mxu1 }
 0x10b   : > { %1042 = vst [vmem:[%s3985_s30 + $0x30] sm:$0xff] %v826_v41  ;;  %v830_v45 = vpop.f32.mrb[7].mxu1 }
 0x10c   : > { %1043 = vst [vmem:[%s3985_s30 + $0x38] sm:$0xff] %v828_v43 }
 0x116   : > { %v866_v46 = vpop.f32.mrb[8].mxu0 }
 0x117   : > { %v867_v47 = vadd.f32 %v866_v46, %v3980_v24  ;;  %v868_v48 = vpop.f32.mrb[9].mxu0 }
 0x118   : > { %v869_v49 = vadd.f32 %v868_v48, %v3980_v24  ;;  %v870_v50 = vpop.f32.mrb[10].mxu0  ;;  %v907_v52 = vpop.f32.mrb[8].mxu1 }
 0x119   : > { %1044 = vst [vmem:[%s3985_s30 + $0x40] sm:$0xff] %v867_v47  ;;  %v871_v51 = vpop.f32.mrb[11].mxu0  ;;  %v908_v53 = vadd.f32 %v907_v52, %v3980_v24  ;;  %v909_v54 = vpop.f32.mrb[9].mxu1 }
 0x11a   : > { %1045 = vst [vmem:[%s3985_s30 + $0x48] sm:$0xff] %v869_v49  ;;  %v910_v55 = vadd.f32 %v909_v54, %v3980_v24  ;;  %v911_v56 = vpop.f32.mrb[10].mxu1 }
 0x11b   : > { %1046 = vst [vmem:[%s3985_s30 + $0x50] sm:$0xff] %v908_v53  ;;  %v912_v57 = vpop.f32.mrb[11].mxu1 }
 0x11c   : > { %1047 = vst [vmem:[%s3985_s30 + $0x58] sm:$0xff] %v910_v55 }
 0x126   : > { %v948_v58 = vpop.f32.mrb[12].mxu0 }
 0x127   : > { %v949_v59 = vadd.f32 %v948_v58, %v3980_v24  ;;  %v950_v60 = vpop.f32.mrb[13].mxu0 }
 0x128   : > { %v951_v61 = vadd.f32 %v950_v60, %v3980_v24  ;;  %v952_v62 = vpop.f32.mrb[14].mxu0  ;;  %v989_v0 = vpop.f32.mrb[12].mxu1 }
 0x129   : > { %1048 = vst [vmem:[%s3985_s30 + $0x60] sm:$0xff] %v949_v59  ;;  %v953_v63 = vpop.f32.mrb[15].mxu0  ;;  %v990_v2 = vadd.f32 %v989_v0, %v3980_v24  ;;  %v991_v3 = vpop.f32.mrb[13].mxu1 }
 0x12a   : > { %1049 = vst [vmem:[%s3985_s30 + $0x68] sm:$0xff] %v951_v61  ;;  %v992_v5 = vadd.f32 %v991_v3, %v3980_v24  ;;  %v993_v6 = vpop.f32.mrb[14].mxu1 }
 0x12b   : > { %1050 = vst [vmem:[%s3985_s30 + $0x70] sm:$0xff] %v990_v2  ;;  %v994_v7 = vpop.f32.mrb[15].mxu1  ;;  %v4057_v2 = vpop.permute.xlu1 %1945 }
 0x12c   : > { %1051 = vst [vmem:[%s3985_s30 + $0x78] sm:$0xff] %v992_v5 }
 0x136   : > { %v1030_v8 = vpop.f32.mrb[16].mxu0 }
 0x137   : > { %v1031_v9 = vadd.f32 %v1030_v8, %v3980_v24  ;;  %v3229_v10 = vpop.f32.mrb[17].mxu0 }
 0x138   : > { %v1033_v11 = vpop.f32.mrb[18].mxu0  ;;  %v1515_v14 = vpop.f32.mrb[16].mxu1 }
 0x139   : > { %1052 = vst [vmem:[%s3985_s30 + $0x80] sm:$0xff] %v1031_v9  ;;  %v3230_v12 = vpop.f32.mrb[19].mxu0  ;;  %v1517_v15 = vpop.f32.mrb[17].mxu1  ;;  %v1516_v16 = vadd.f32 %v1515_v14, %v4021_v13 }
 0x13a   : > { %v1519_v17 = vpop.f32.mrb[18].mxu1  ;;  %v1518_v19 = vadd.f32 %v1517_v15, %v4021_v13 }
 0x13b   : > { %3018 = vst [vmem:[%s3985_s30 + $0x88] sm:$0xff] %v1516_v16  ;;  %v1520_v20 = vpop.f32.mrb[19].mxu1 }
 0x13c   : > { %3019 = vst [vmem:[%s3985_s30 + $0x90] sm:$0xff] %v1518_v19 }
 0x146   : > { %v1556_v1 = vpop.f32.mrb[20].mxu0 }
 0x147   : > { %v1557_v21 = vadd.f32 %v1556_v1, %v4021_v13  ;;  %v1558_v23 = vpop.f32.mrb[21].mxu0 }
 0x148   : > { %v1559_v24 = vadd.f32 %v1558_v23, %v4021_v13  ;;  %v1560_v25 = vpop.f32.mrb[22].mxu0  ;;  %v1597_v4 = vpop.f32.mrb[20].mxu1 }
 0x149   : > { %3020 = vst [vmem:[%s3985_s30 + $0x98] sm:$0xff] %v1557_v21  ;;  %v1561_v26 = vpop.f32.mrb[23].mxu0  ;;  %v1598_v27 = vadd.f32 %v1597_v4, %v4021_v13  ;;  %v1599_v18 = vpop.f32.mrb[21].mxu1 }
 0x14a   : > { %3021 = vst [vmem:[%s3985_s30 + $0xa0] sm:$0xff] %v1559_v24  ;;  %v1600_v28 = vadd.f32 %v1599_v18, %v4021_v13  ;;  %v1601_v29 = vpop.f32.mrb[22].mxu1 }
 0x14b   : > { %3022 = vst [vmem:[%s3985_s30 + $0xa8] sm:$0xff] %v1598_v27  ;;  %v1602_v30 = vpop.f32.mrb[23].mxu1 }
 0x14c   : > { %3023 = vst [vmem:[%s3985_s30 + $0xb0] sm:$0xff] %v1600_v28 }
 0x156   : > { %v1638_v22 = vpop.f32.mrb[24].mxu0 }
 0x157   : > { %v1639_v31 = vadd.f32 %v1638_v22, %v4021_v13  ;;  %v1640_v32 = vpop.f32.mrb[25].mxu0 }
 0x158   : > { %v1641_v33 = vadd.f32 %v1640_v32, %v4021_v13  ;;  %v1642_v34 = vpop.f32.mrb[26].mxu0  ;;  %v1679_v36 = vpop.f32.mrb[24].mxu1 }
 0x159   : > { %3024 = vst [vmem:[%s3985_s30 + $0xb8] sm:$0xff] %v1639_v31  ;;  %v1643_v35 = vpop.f32.mrb[27].mxu0  ;;  %v1680_v37 = vadd.f32 %v1679_v36, %v4021_v13  ;;  %v1681_v38 = vpop.f32.mrb[25].mxu1 }
 0x15a   : > { %3025 = vst [vmem:[%s3985_s30 + $0xc0] sm:$0xff] %v1641_v33  ;;  %v1682_v39 = vadd.f32 %v1681_v38, %v4021_v13  ;;  %v1683_v40 = vpop.f32.mrb[26].mxu1 }
 0x15b   : > { %3026 = vst [vmem:[%s3985_s30 + $0xc8] sm:$0xff] %v1680_v37  ;;  %v1684_v41 = vpop.f32.mrb[27].mxu1 }
 0x15c   : > { %3027 = vst [vmem:[%s3985_s30 + $0xd0] sm:$0xff] %v1682_v39 }
 0x166   : > { %v1720_v42 = vpop.f32.mrb[28].mxu0 }
 0x167   : > { %v1721_v43 = vadd.f32 %v1720_v42, %v4021_v13  ;;  %v1722_v44 = vpop.f32.mrb[29].mxu0 }
 0x168   : > { %v1723_v45 = vadd.f32 %v1722_v44, %v4021_v13  ;;  %v1724_v46 = vpop.f32.mrb[30].mxu0  ;;  %v1761_v48 = vpop.f32.mrb[28].mxu1 }
 0x169   : > { %3028 = vst [vmem:[%s3985_s30 + $0xd8] sm:$0xff] %v1721_v43  ;;  %v1725_v47 = vpop.f32.mrb[31].mxu0  ;;  %v1762_v49 = vadd.f32 %v1761_v48, %v4021_v13  ;;  %v1763_v50 = vpop.f32.mrb[29].mxu1 }
 0x16a   : > { %3029 = vst [vmem:[%s3985_s30 + $0xe0] sm:$0xff] %v1723_v45  ;;  %v1764_v51 = vadd.f32 %v1763_v50, %v4021_v13  ;;  %v1765_v52 = vpop.f32.mrb[30].mxu1 }
 0x16b   : > { %3030 = vst [vmem:[%s3985_s30 + $0xe8] sm:$0xff] %v1762_v49  ;;  %v1766_v53 = vpop.f32.mrb[31].mxu1 }
 0x16c   : > { %3031 = vst [vmem:[%s3985_s30 + $0xf0] sm:$0xff] %v1764_v51 }
 0x176   : > { %v1802_v54 = vpop.f32.mrb[32].mxu0 }
 0x177   : > { %v1803_v55 = vadd.f32 %v1802_v54, %v4021_v13  ;;  %v1804_v56 = vpop.f32.mrb[33].mxu0 }
 0x178   : > { %v1805_v57 = vadd.f32 %v1804_v56, %v4021_v13  ;;  %v1806_v58 = vpop.f32.mrb[34].mxu0  ;;  %v1843_v60 = vpop.f32.mrb[32].mxu1 }
 0x179   : > { %3032 = vst [vmem:[%s3985_s30 + $0xf8] sm:$0xff] %v1803_v55  ;;  %v1807_v59 = vpop.f32.mrb[35].mxu0  ;;  %v1844_v61 = vadd.f32 %v1843_v60, %v4021_v13  ;;  %v3241_v62 = vpop.f32.mrb[33].mxu1 }
 0x17a   : > { %3033 = vst [vmem:[%s3985_s30 + $0x100] sm:$0xff] %v1805_v57  ;;  %v1846_v63 = vpop.f32.mrb[34].mxu1 }
 0x17b   : > { %3034 = vst [vmem:[%s3985_s30 + $0x108] sm:$0xff] %v1844_v61  ;;  %v3242_v0 = vpop.f32.mrb[35].mxu1 }
 0x186   : > { %v2329_v3 = vpop.f32.mrb[36].mxu0 }
 0x187   : > { %v2330_v5 = vadd.f32 %v2329_v3, %v4057_v2  ;;  %v2331_v6 = vpop.f32.mrb[37].mxu0 }
 0x188   : > { %v2332_v7 = vadd.f32 %v2331_v6, %v4057_v2  ;;  %v2333_v8 = vpop.f32.mrb[38].mxu0  ;;  %v2370_v10 = vpop.f32.mrb[36].mxu1 }
 0x189   : > { %3185 = vst [vmem:[%s3985_s30 + $0x110] sm:$0xff] %v2330_v5  ;;  %v2334_v9 = vpop.f32.mrb[39].mxu0  ;;  %v2371_v11 = vadd.f32 %v2370_v10, %v4057_v2  ;;  %v2372_v12 = vpop.f32.mrb[37].mxu1 }
 0x18a   : > { %3186 = vst [vmem:[%s3985_s30 + $0x118] sm:$0xff] %v2332_v7  ;;  %v2373_v13 = vadd.f32 %v2372_v12, %v4057_v2  ;;  %v2374_v14 = vpop.f32.mrb[38].mxu1 }
 0x18b   : > { %3187 = vst [vmem:[%s3985_s30 + $0x120] sm:$0xff] %v2371_v11  ;;  %v2375_v15 = vpop.f32.mrb[39].mxu1 }
 0x18c   : > { %3188 = vst [vmem:[%s3985_s30 + $0x128] sm:$0xff] %v2373_v13 }
 0x196   : > { %v2411_v16 = vpop.f32.mrb[40].mxu0 }
 0x197   : > { %v2412_v17 = vadd.f32 %v2411_v16, %v4057_v2  ;;  %v2413_v19 = vpop.f32.mrb[41].mxu0 }
 0x198   : > { %v2414_v20 = vadd.f32 %v2413_v19, %v4057_v2  ;;  %v2415_v1 = vpop.f32.mrb[42].mxu0  ;;  %v2452_v23 = vpop.f32.mrb[40].mxu1 }
 0x199   : > { %3189 = vst [vmem:[%s3985_s30 + $0x130] sm:$0xff] %v2412_v17  ;;  %v2416_v21 = vpop.f32.mrb[43].mxu0  ;;  %v2453_v24 = vadd.f32 %v2452_v23, %v4057_v2  ;;  %v2454_v25 = vpop.f32.mrb[41].mxu1 }
 0x19a   : > { %3190 = vst [vmem:[%s3985_s30 + $0x138] sm:$0xff] %v2414_v20  ;;  %v2455_v26 = vadd.f32 %v2454_v25, %v4057_v2  ;;  %v2456_v4 = vpop.f32.mrb[42].mxu1 }
 0x19b   : > { %3191 = vst [vmem:[%s3985_s30 + $0x140] sm:$0xff] %v2453_v24  ;;  %v2457_v27 = vpop.f32.mrb[43].mxu1 }
 0x19c   : > { %3192 = vst [vmem:[%s3985_s30 + $0x148] sm:$0xff] %v2455_v26 }
 0x1a6   : > { %v2493_v18 = vpop.f32.mrb[44].mxu0 }
 0x1a7   : > { %v2494_v28 = vadd.f32 %v2493_v18, %v4057_v2  ;;  %v2495_v29 = vpop.f32.mrb[45].mxu0 }
 0x1a8   : > { %v2496_v30 = vadd.f32 %v2495_v29, %v4057_v2  ;;  %v2497_v22 = vpop.f32.mrb[46].mxu0  ;;  %v2534_v32 = vpop.f32.mrb[44].mxu1 }
 0x1a9   : > { %3193 = vst [vmem:[%s3985_s30 + $0x150] sm:$0xff] %v2494_v28  ;;  %v2498_v31 = vpop.f32.mrb[47].mxu0  ;;  %v2535_v33 = vadd.f32 %v2534_v32, %v4057_v2  ;;  %v2536_v34 = vpop.f32.mrb[45].mxu1 }
 0x1aa   : > { %3194 = vst [vmem:[%s3985_s30 + $0x158] sm:$0xff] %v2496_v30  ;;  %v2537_v35 = vadd.f32 %v2536_v34, %v4057_v2  ;;  %v2538_v36 = vpop.f32.mrb[46].mxu1 }
 0x1ab   : > { %3195 = vst [vmem:[%s3985_s30 + $0x160] sm:$0xff] %v2535_v33  ;;  %v2539_v37 = vpop.f32.mrb[47].mxu1 }
 0x1ac   : > { %3196 = vst [vmem:[%s3985_s30 + $0x168] sm:$0xff] %v2537_v35 }
 0x1b6   : > { %v2575_v38 = vpop.f32.mrb[48].mxu0 }
 0x1b7   : > { %v2576_v39 = vadd.f32 %v2575_v38, %v4057_v2  ;;  %v2577_v40 = vpop.f32.mrb[49].mxu0 }
 0x1b8   : > { %v2578_v41 = vadd.f32 %v2577_v40, %v4057_v2  ;;  %v2579_v42 = vpop.f32.mrb[50].mxu0  ;;  %v2616_v44 = vpop.f32.mrb[48].mxu1 }
 0x1b9   : > { %3197 = vst [vmem:[%s3985_s30 + $0x170] sm:$0xff] %v2576_v39  ;;  %v2580_v43 = vpop.f32.mrb[51].mxu0  ;;  %v2617_v45 = vadd.f32 %v2616_v44, %v4057_v2  ;;  %v2618_v46 = vpop.f32.mrb[49].mxu1 }
 0x1ba   : > { %3198 = vst [vmem:[%s3985_s30 + $0x178] sm:$0xff] %v2578_v41  ;;  %v2619_v47 = vadd.f32 %v2618_v46, %v4057_v2  ;;  %v2620_v48 = vpop.f32.mrb[50].mxu1 }
 0x1bb   : > { %3199 = vst [vmem:[%s3985_s30 + $0x180] sm:$0xff] %v2617_v45  ;;  %v2621_v49 = vpop.f32.mrb[51].mxu1 }
 0x1bc   : > { %3200 = vst [vmem:[%s3985_s30 + $0x188] sm:$0xff] %v2619_v47 }
 0x1c6   : > { %v2657_v50 = vpop.f32.mrb[52].mxu0 }
 0x1c7   : > { %v2658_v51 = vadd.f32 %v2657_v50, %v4057_v2  ;;  %v3253_v52 = vpop.f32.mrb[53].mxu0 }
 0x1c8   : > { %v2660_v53 = vpop.f32.mrb[54].mxu0 }
 0x1c9   : > { %3201 = vst [vmem:[%s3985_s30 + $0x190] sm:$0xff] %v2658_v51  ;;  %v3254_v54 = vpop.f32.mrb[55].mxu0 }
 0x1ca PF: > { %s13_s14 = sadd.s32 1, %s3608_s14   ;;  %s4106_s12 = smov %s3604_s13 }
 0x1cb   : > { %p10_p5 = scmp.ge.s32.totalorder %s13_s14, 6   ;;  %s4107_s13 = smov %s4109_s15 }
 0x1cd   :  { %12 = sbr.rel (!%p10_p5) target bundleno = 2 (0x2), region = 71 }

</bundles_post_ra>
